<compile_context>
chip_gen: v7x
topology: tpu7x:2x2x1
jax: 0.10.0
libtpu: 0.0.40
codegen_flags: <defaults>
</compile_context>

<pallas_src>
import functools
import math

import jax
import jax.numpy as jnp
from jax import lax
from jax.experimental import pallas as pl
from jax.experimental.pallas import tpu as pltpu

_LN_EPS = 1e-5  # nn.LayerNorm default


def _layernorm_f32(x, gamma, beta):
    """LayerNorm over last dim (biased variance, matches torch), f32."""
    mean = jnp.mean(x, axis=-1, keepdims=True)
    var = jnp.mean((x - mean) ** 2, axis=-1, keepdims=True)
    scale = gamma * lax.rsqrt(var + _LN_EPS)   # fold gamma into rsqrt scale
    return (x - mean) * scale + beta


# ---------------------------------------------------------------------------
# Fully fused kernel:  x + MHA(ln_1(x))  then  + c_proj(QuickGELU(c_fc(ln_2(.))))
# One batch element per grid step; weights stay VMEM-resident across steps.
# ---------------------------------------------------------------------------
def _residual_block_kernel(x_ref, g1_ref, b1_ref, wqkv_ref, bqkv_ref, wo_ref,
                           bo_ref, mask_ref, g2_ref, b2_ref, w1_ref, bm1_ref,
                           w2_ref, bm2_ref, o_ref, *, n_head, compute_dtype):
    S, D = x_ref.shape
    hd = D // n_head
    inv_sqrt_hd = 1.0 / math.sqrt(hd)

    x = x_ref[...].astype(jnp.float32)                          # (S, D)

    # ---- attention branch --------------------------------------------------
    xn = _layernorm_f32(x, g1_ref[...], b1_ref[...])

    # Fused QKV projection against stacked [Wq | Wk | Wv]^T  -> (S, 3D)
    qkv = jnp.dot(xn.astype(compute_dtype), wqkv_ref[...],
                  preferred_element_type=jnp.float32) + bqkv_ref[...]
    q = qkv[:, :D]
    k = qkv[:, D:2 * D]
    v = qkv[:, 2 * D:]

    mask = mask_ref[...].astype(jnp.float32)                    # (S, S) additive

    # Per-head attention; the out-projection is accumulated head by head
    # (out = sum_h softmax(q_h k_h^T / sqrt(hd) + mask) v_h @ Wo[h*hd:(h+1)*hd])
    # so no in-kernel concat is needed.
    attn = jnp.zeros((S, D), jnp.float32)
    for h in range(n_head):
        sl = slice(h * hd, (h + 1) * hd)
        qh = q[:, sl].astype(compute_dtype)
        kh = k[:, sl].astype(compute_dtype)
        vh = v[:, sl].astype(compute_dtype)
        s = lax.dot_general(qh, kh, (((1,), (1,)), ((), ())),
                            preferred_element_type=jnp.float32)   # (S, S)
        s = s * inv_sqrt_hd + mask
        s = s - jnp.max(s, axis=-1, keepdims=True)
        p = jnp.exp(s)
        p = p / jnp.sum(p, axis=-1, keepdims=True)
        oh = jnp.dot(p.astype(compute_dtype), vh,
                     preferred_element_type=jnp.float32)           # (S, hd)
        attn = attn + jnp.dot(oh.astype(compute_dtype), wo_ref[sl, :],
                              preferred_element_type=jnp.float32)

    x1 = x + attn + bo_ref[...]                                  # residual 1

    # ---- MLP branch ----------------------------------------------------------
    xn2 = _layernorm_f32(x1, g2_ref[...], b2_ref[...])
    hmid = jnp.dot(xn2.astype(compute_dtype), w1_ref[...],
                   preferred_element_type=jnp.float32) + bm1_ref[...]
    # QuickGELU: x * sigmoid(1.702 * x)   (sigmoid -> EUP slot)
    hmid = hmid * jax.nn.sigmoid(1.702 * hmid)
    x2 = x1 + jnp.dot(hmid.astype(compute_dtype), w2_ref[...],
                      preferred_element_type=jnp.float32) + bm2_ref[...]

    o_ref[...] = x2.astype(o_ref.dtype)                          # residual 2


# ---------------------------------------------------------------------------
# Wrapper
# ---------------------------------------------------------------------------
def residual_attention_block(x_sbd, params, attn_mask=None, *, n_head,
                             compute_dtype=jnp.bfloat16):
    """Full block. x_sbd: (S, B, D) — torch nn.MultiheadAttention layout."""
    S, B, D = x_sbd.shape
    H = params["w1"].shape[1]
    hd = D // n_head

    x_bsd = jnp.transpose(x_sbd, (1, 0, 2))                     # (B, S, D)

    if attn_mask is None:
        attn_mask = jnp.zeros((S, S), jnp.float32)
    mask = attn_mask.astype(jnp.float32)

    # LayerNorm params / biases stay f32; matmul weights shipped as bf16.
    g1 = params["ln1_g"].reshape(1, D).astype(jnp.float32)
    b1 = params["ln1_b"].reshape(1, D).astype(jnp.float32)
    g2 = params["ln2_g"].reshape(1, D).astype(jnp.float32)
    b2 = params["ln2_b"].reshape(1, D).astype(jnp.float32)
    bqkv = params["bqkv"].reshape(1, 3 * D).astype(jnp.float32)
    bo = params["bo"].reshape(1, D).astype(jnp.float32)
    bm1 = params["b1"].reshape(1, H).astype(jnp.float32)
    bm2 = params["b2"].reshape(1, D).astype(jnp.float32)
    wqkv = params["wqkv"].astype(compute_dtype)
    wo = params["wo"].astype(compute_dtype)
    w1 = params["w1"].astype(compute_dtype)
    w2 = params["w2"].astype(compute_dtype)

    attn_flops = B * (2 * S * D * 3 * D + 4 * n_head * S * S * hd
                      + 2 * S * D * D)
    mlp_flops = B * 4 * S * D * H
    weight_bytes = sum(w.size * w.dtype.itemsize for w in (wqkv, wo, w1, w2))
    bytes_accessed = 2 * x_bsd.size * x_bsd.dtype.itemsize + weight_bytes

    kernel = functools.partial(_residual_block_kernel, n_head=n_head,
                               compute_dtype=compute_dtype)

    # TODO(synk): for very long sequences / large d_model the per-batch slab +
    # bf16 weights may exceed VMEM; switch to a flash-style (q-tile, kv-tile)
    # attention grid plus a row-tiled MLP kernel in that regime.
    out_bsd = pl.pallas_call(
        kernel,
        out_shape=jax.ShapeDtypeStruct((B, S, D), x_bsd.dtype),
        grid_spec=pltpu.PrefetchScalarGridSpec(
            num_scalar_prefetch=0,
            grid=(B,),
            in_specs=[
                pl.BlockSpec((None, S, D), lambda b: (b, 0, 0)),   # x (per batch)
                pl.BlockSpec((1, D), lambda b: (0, 0)),            # ln_1 gamma
                pl.BlockSpec((1, D), lambda b: (0, 0)),            # ln_1 beta
                pl.BlockSpec((D, 3 * D), lambda b: (0, 0)),        # Wqkv^T
                pl.BlockSpec((1, 3 * D), lambda b: (0, 0)),        # bqkv
                pl.BlockSpec((D, D), lambda b: (0, 0)),            # Wo^T
                pl.BlockSpec((1, D), lambda b: (0, 0)),            # bo
                pl.BlockSpec((S, S), lambda b: (0, 0)),            # additive mask
                pl.BlockSpec((1, D), lambda b: (0, 0)),            # ln_2 gamma
                pl.BlockSpec((1, D), lambda b: (0, 0)),            # ln_2 beta
                pl.BlockSpec((D, H), lambda b: (0, 0)),            # W1^T (c_fc)
                pl.BlockSpec((1, H), lambda b: (0, 0)),            # b1
                pl.BlockSpec((H, D), lambda b: (0, 0)),            # W2^T (c_proj)
                pl.BlockSpec((1, D), lambda b: (0, 0)),            # b2
            ],
            out_specs=pl.BlockSpec((None, S, D), lambda b: (b, 0, 0)),
        ),
        compiler_params=pltpu.CompilerParams(
            dimension_semantics=("parallel",),        # shards over v7x's 2 TCs
            vmem_limit_bytes=32 * 1024 * 1024),
        cost_estimate=pl.CostEstimate(
            flops=int(attn_flops + mlp_flops),
            transcendentals=int(B * (n_head * S * S + S * H)),
            bytes_accessed=int(bytes_accessed)),
    )(x_bsd, g1, b1, wqkv, bqkv, wo, bo, mask, g2, b2, w1, bm1, w2, bm2)

    return jnp.transpose(out_bsd, (1, 0, 2))


# ---------------------------------------------------------------------------
# Pure-JAX reference (same math, same bf16 matmul operands, f32 accumulation)
# ---------------------------------------------------------------------------
def _reference(x_sbd, params, attn_mask, n_head, compute_dtype):
    def ln(x, g, b):
        mu = jnp.mean(x, -1, keepdims=True)
        va = jnp.mean((x - mu) ** 2, -1, keepdims=True)
        return (x - mu) * (g * lax.rsqrt(va + _LN_EPS)) + b

    def mm(a, w):
        return jnp.dot(a.astype(compute_dtype), w.astype(compute_dtype),
                       preferred_element_type=jnp.float32)

    x = jnp.transpose(x_sbd, (1, 0, 2)).astype(jnp.float32)     # (B, S, D)
    B, S, D = x.shape
    hd = D // n_head
    mask = (jnp.zeros((S, S), jnp.float32) if attn_mask is None
            else attn_mask.astype(jnp.float32))

    xn = ln(x, params["ln1_g"], params["ln1_b"])
    qkv = mm(xn, params["wqkv"]) + params["bqkv"]
    q, k, v = qkv[..., :D], qkv[..., D:2 * D], qkv[..., 2 * D:]
    out = jnp.zeros_like(x)
    for h in range(n_head):
        sl = slice(h * hd, (h + 1) * hd)
        s = jnp.einsum("bqd,bkd->bqk", q[..., sl].astype(compute_dtype),
                       k[..., sl].astype(compute_dtype),
                       preferred_element_type=jnp.float32)
        s = s * (1.0 / math.sqrt(hd)) + mask
        s = s - jnp.max(s, axis=-1, keepdims=True)
        p = jnp.exp(s)
        p = p / jnp.sum(p, axis=-1, keepdims=True)
        oh = jnp.einsum("bqk,bkd->bqd", p.astype(compute_dtype),
                        v[..., sl].astype(compute_dtype),
                        preferred_element_type=jnp.float32)
        out = out + mm(oh, params["wo"][sl, :])
    x = x + out + params["bo"]

    xn2 = ln(x, params["ln2_g"], params["ln2_b"])
    h1 = mm(xn2, params["w1"]) + params["b1"]
    h1 = h1 * jax.nn.sigmoid(1.702 * h1)
    x = x + mm(h1, params["w2"]) + params["b2"]
    return jnp.transpose(x, (1, 0, 2))


if __name__ == "__main__":
    # Small shapes consistent with the module (lane-dense d_model).
    S, B, D, n_head = 8, 2, 128, 4
    H = 4 * D

    key = jax.random.PRNGKey(0)
    ks = jax.random.split(key, 12)

    x = jax.random.normal(ks[0], (S, B, D), dtype=jnp.float32)

    def init(k, shape, scale=0.05):
        return (scale * jax.random.normal(k, shape)).astype(jnp.float32)

    # Weights stored transposed vs torch, i.e. shape (in_features, out_features):
    # wqkv = in_proj_weight.T, wo = out_proj.weight.T, w1 = c_fc.weight.T, ...
    params = dict(
        ln1_g=jnp.ones((D,), jnp.float32) + init(ks[1], (D,), 0.01),
        ln1_b=init(ks[2], (D,), 0.01),
        wqkv=init(ks[3], (D, 3 * D)),
        bqkv=init(ks[4], (3 * D,)),
        wo=init(ks[5], (D, D)),
        bo=init(ks[6], (D,)),
        ln2_g=jnp.ones((D,), jnp.float32) + init(ks[7], (D,), 0.01),
        ln2_b=init(ks[8], (D,), 0.01),
        w1=init(ks[9], (D, H)),
        b1=init(ks[10], (H,)),
        w2=init(ks[11], (H, D)),
        b2=jnp.zeros((D,), jnp.float32),
    )

    # Causal additive float mask (same convention as torch float attn_mask).
    # TODO(synk): boolean attn_mask / key_padding_mask variants are not
    # supported; convert to an additive float mask on the caller side.
    causal = jnp.where(jnp.triu(jnp.ones((S, S), dtype=bool), k=1),
                       -1e9, 0.0).astype(jnp.float32)

    y = residual_attention_block(x, params, attn_mask=causal, n_head=n_head)
    jax.block_until_ready(y)

    y_ref = _reference(x, params, causal, n_head, jnp.bfloat16)
    assert y.shape == (S, B, D)
    assert jnp.allclose(y, y_ref, atol=2e-3, rtol=2e-3), \
        float(jnp.max(jnp.abs(y - y_ref)))
    print("KERNEL_OK")
</pallas_src>

<mosaic_0001>
module attributes {stable_mosaic.version = 11 : i64} {
  func.func @_residual_block_kernel(%arg0: i32, %arg1: memref<1x8x128xf32, #tpu.memory_space<vmem>>, %arg2: memref<1x128xf32, #tpu.memory_space<vmem>>, %arg3: memref<1x128xf32, #tpu.memory_space<vmem>>, %arg4: memref<128x384xbf16, #tpu.memory_space<vmem>>, %arg5: memref<1x384xf32, #tpu.memory_space<vmem>>, %arg6: memref<128x128xbf16, #tpu.memory_space<vmem>>, %arg7: memref<1x128xf32, #tpu.memory_space<vmem>>, %arg8: memref<8x8xf32, #tpu.memory_space<vmem>>, %arg9: memref<1x128xf32, #tpu.memory_space<vmem>>, %arg10: memref<1x128xf32, #tpu.memory_space<vmem>>, %arg11: memref<128x512xbf16, #tpu.memory_space<vmem>>, %arg12: memref<1x512xf32, #tpu.memory_space<vmem>>, %arg13: memref<512x128xbf16, #tpu.memory_space<vmem>>, %arg14: memref<1x128xf32, #tpu.memory_space<vmem>>, %arg15: memref<1x8x128xf32, #tpu.memory_space<vmem>>) attributes {dimension_semantics = [#tpu.dimension_semantics<parallel>], iteration_bounds = array<i64: 2>, scalar_prefetch = 0 : i64, scratch_operands = 0 : i64, tpu.core_type = #tpu.core_type<tc>, window_params = [{transform_indices = @transform_0, window_bounds = array<i64: 1, 8, 128>}, {pipeline_mode = #tpu.pipeline_mode<synchronous>, transform_indices = @transform_1, window_bounds = array<i64: 1, 128>}, {pipeline_mode = #tpu.pipeline_mode<synchronous>, transform_indices = @transform_2, window_bounds = array<i64: 1, 128>}, {pipeline_mode = #tpu.pipeline_mode<synchronous>, transform_indices = @transform_3, window_bounds = array<i64: 128, 384>}, {pipeline_mode = #tpu.pipeline_mode<synchronous>, transform_indices = @transform_4, window_bounds = array<i64: 1, 384>}, {pipeline_mode = #tpu.pipeline_mode<synchronous>, transform_indices = @transform_5, window_bounds = array<i64: 128, 128>}, {pipeline_mode = #tpu.pipeline_mode<synchronous>, transform_indices = @transform_6, window_bounds = array<i64: 1, 128>}, {pipeline_mode = #tpu.pipeline_mode<synchronous>, transform_indices = @transform_7, window_bounds = array<i64: 8, 8>}, {pipeline_mode = #tpu.pipeline_mode<synchronous>, transform_indices = @transform_8, window_bounds = array<i64: 1, 128>}, {pipeline_mode = #tpu.pipeline_mode<synchronous>, transform_indices = @transform_9, window_bounds = array<i64: 1, 128>}, {pipeline_mode = #tpu.pipeline_mode<synchronous>, transform_indices = @transform_10, window_bounds = array<i64: 128, 512>}, {pipeline_mode = #tpu.pipeline_mode<synchronous>, transform_indices = @transform_11, window_bounds = array<i64: 1, 512>}, {pipeline_mode = #tpu.pipeline_mode<synchronous>, transform_indices = @transform_12, window_bounds = array<i64: 512, 128>}, {pipeline_mode = #tpu.pipeline_mode<synchronous>, transform_indices = @transform_13, window_bounds = array<i64: 1, 128>}, {transform_indices = @transform_14, window_bounds = array<i64: 1, 8, 128>}]} {
    %c0 = arith.constant 0 : index
    %c0_0 = arith.constant 0 : index
    %c0_1 = arith.constant 0 : index
    %0 = vector.load %arg1[%c0, %c0_0, %c0_1] : memref<1x8x128xf32, #tpu.memory_space<vmem>>, vector<1x8x128xf32>
    %1 = vector.shape_cast %0 : vector<1x8x128xf32> to vector<8x128xf32>
    %c0_2 = arith.constant 0 : index
    %c0_3 = arith.constant 0 : index
    %2 = vector.load %arg2[%c0_2, %c0_3] : memref<1x128xf32, #tpu.memory_space<vmem>>, vector<1x128xf32>
    %c0_4 = arith.constant 0 : index
    %c0_5 = arith.constant 0 : index
    %3 = vector.load %arg3[%c0_4, %c0_5] : memref<1x128xf32, #tpu.memory_space<vmem>>, vector<1x128xf32>
    %cst = arith.constant dense<0.000000e+00> : vector<8xf32>
    %4 = vector.multi_reduction <add>, %1, %cst [1] : vector<8x128xf32> to vector<8xf32>
    %5 = vector.shape_cast %4 : vector<8xf32> to vector<8x1xf32>
    %cst_6 = arith.constant 1.280000e+02 : f32
    %6 = vector.broadcast %cst_6 : f32 to vector<8x1xf32>
    %7 = arith.divf %5, %6 : vector<8x1xf32>
    %8 = vector.broadcast %7 : vector<8x1xf32> to vector<8x128xf32>
    %9 = arith.subf %1, %8 : vector<8x128xf32>
    %10 = arith.mulf %9, %9 : vector<8x128xf32>
    %cst_7 = arith.constant dense<0.000000e+00> : vector<8xf32>
    %11 = vector.multi_reduction <add>, %10, %cst_7 [1] : vector<8x128xf32> to vector<8xf32>
    %12 = vector.shape_cast %11 : vector<8xf32> to vector<8x1xf32>
    %cst_8 = arith.constant 1.280000e+02 : f32
    %13 = vector.broadcast %cst_8 : f32 to vector<8x1xf32>
    %14 = arith.divf %12, %13 : vector<8x1xf32>
    %cst_9 = arith.constant 9.99999974E-6 : f32
    %15 = vector.broadcast %cst_9 : f32 to vector<8x1xf32>
    %16 = arith.addf %14, %15 : vector<8x1xf32>
    %17 = math.rsqrt %16 : vector<8x1xf32>
    %18 = vector.broadcast %2 : vector<1x128xf32> to vector<8x128xf32>
    %19 = vector.broadcast %17 : vector<8x1xf32> to vector<8x128xf32>
    %20 = arith.mulf %18, %19 : vector<8x128xf32>
    %21 = vector.broadcast %7 : vector<8x1xf32> to vector<8x128xf32>
    %22 = arith.subf %1, %21 : vector<8x128xf32>
    %23 = arith.mulf %22, %20 : vector<8x128xf32>
    %24 = vector.broadcast %3 : vector<1x128xf32> to vector<8x128xf32>
    %25 = arith.addf %23, %24 : vector<8x128xf32>
    %26 = arith.truncf %25 : vector<8x128xf32> to vector<8x128xbf16>
    %c0_10 = arith.constant 0 : index
    %c0_11 = arith.constant 0 : index
    %27 = vector.load %arg4[%c0_10, %c0_11] : memref<128x384xbf16, #tpu.memory_space<vmem>>, vector<128x384xbf16>
    %cst_12 = arith.constant dense<0.000000e+00> : vector<8x384xf32>
    %28 = tpu.matmul %26, %27, %cst_12 {dimension_numbers = #tpu.dot_dimension_numbers<[1], [0], [0], [1], [0, 0, 1, 1], [], []>} : vector<8x128xbf16>, vector<128x384xbf16>, vector<8x384xf32> -> vector<8x384xf32>
    %c0_13 = arith.constant 0 : index
    %c0_14 = arith.constant 0 : index
    %29 = vector.load %arg5[%c0_13, %c0_14] : memref<1x384xf32, #tpu.memory_space<vmem>>, vector<1x384xf32>
    %30 = vector.broadcast %29 : vector<1x384xf32> to vector<8x384xf32>
    %31 = arith.addf %28, %30 : vector<8x384xf32>
    %32 = vector.extract_strided_slice %31 {offsets = [0, 0], sizes = [8, 128], strides = [1, 1]} : vector<8x384xf32> to vector<8x128xf32>
    %33 = vector.extract_strided_slice %31 {offsets = [0, 128], sizes = [8, 128], strides = [1, 1]} : vector<8x384xf32> to vector<8x128xf32>
    %34 = vector.extract_strided_slice %31 {offsets = [0, 256], sizes = [8, 128], strides = [1, 1]} : vector<8x384xf32> to vector<8x128xf32>
    %c0_15 = arith.constant 0 : index
    %c0_16 = arith.constant 0 : index
    %35 = vector.load %arg8[%c0_15, %c0_16] : memref<8x8xf32, #tpu.memory_space<vmem>>, vector<8x8xf32>
    %cst_17 = arith.constant 0.000000e+00 : f32
    %36 = vector.broadcast %cst_17 : f32 to vector<8x128xf32>
    %37 = vector.extract_strided_slice %32 {offsets = [0, 0], sizes = [8, 32], strides = [1, 1]} : vector<8x128xf32> to vector<8x32xf32>
    %38 = arith.truncf %37 : vector<8x32xf32> to vector<8x32xbf16>
    %39 = vector.extract_strided_slice %33 {offsets = [0, 0], sizes = [8, 32], strides = [1, 1]} : vector<8x128xf32> to vector<8x32xf32>
    %40 = arith.truncf %39 : vector<8x32xf32> to vector<8x32xbf16>
    %41 = vector.extract_strided_slice %34 {offsets = [0, 0], sizes = [8, 32], strides = [1, 1]} : vector<8x128xf32> to vector<8x32xf32>
    %42 = arith.truncf %41 : vector<8x32xf32> to vector<8x32xbf16>
    %cst_18 = arith.constant dense<0.000000e+00> : vector<8x8xf32>
    %43 = tpu.matmul %38, %40, %cst_18 {dimension_numbers = #tpu.dot_dimension_numbers<[1], [1], [0], [0], [0, 0, 1, 0], [], []>} : vector<8x32xbf16>, vector<8x32xbf16>, vector<8x8xf32> -> vector<8x8xf32>
    %cst_19 = arith.constant 0.176776692 : f32
    %44 = vector.broadcast %cst_19 : f32 to vector<8x8xf32>
    %45 = arith.mulf %43, %44 : vector<8x8xf32>
    %46 = arith.addf %45, %35 : vector<8x8xf32>
    %cst_20 = arith.constant dense<0xFF800000> : vector<8xf32>
    %47 = vector.multi_reduction <maximumf>, %46, %cst_20 [1] : vector<8x8xf32> to vector<8xf32>
    %48 = vector.shape_cast %47 : vector<8xf32> to vector<8x1xf32>
    %49 = vector.broadcast %48 : vector<8x1xf32> to vector<8x8xf32>
    %50 = arith.subf %46, %49 : vector<8x8xf32>
    %51 = math.exp %50 : vector<8x8xf32>
    %cst_21 = arith.constant dense<0.000000e+00> : vector<8xf32>
    %52 = vector.multi_reduction <add>, %51, %cst_21 [1] : vector<8x8xf32> to vector<8xf32>
    %53 = vector.shape_cast %52 : vector<8xf32> to vector<8x1xf32>
    %54 = vector.broadcast %53 : vector<8x1xf32> to vector<8x8xf32>
    %55 = arith.divf %51, %54 : vector<8x8xf32>
    %56 = arith.truncf %55 : vector<8x8xf32> to vector<8x8xbf16>
    %cst_22 = arith.constant dense<0.000000e+00> : vector<8x32xf32>
    %57 = tpu.matmul %56, %42, %cst_22 {dimension_numbers = #tpu.dot_dimension_numbers<[1], [0], [0], [1], [0, 0, 1, 1], [], []>} : vector<8x8xbf16>, vector<8x32xbf16>, vector<8x32xf32> -> vector<8x32xf32>
    %58 = arith.truncf %57 : vector<8x32xf32> to vector<8x32xbf16>
    %c0_23 = arith.constant 0 : index
    %c0_24 = arith.constant 0 : index
    %59 = vector.load %arg6[%c0_23, %c0_24] : memref<128x128xbf16, #tpu.memory_space<vmem>>, vector<32x128xbf16>
    %cst_25 = arith.constant dense<0.000000e+00> : vector<8x128xf32>
    %60 = tpu.matmul %58, %59, %cst_25 {dimension_numbers = #tpu.dot_dimension_numbers<[1], [0], [0], [1], [0, 0, 1, 1], [], []>} : vector<8x32xbf16>, vector<32x128xbf16>, vector<8x128xf32> -> vector<8x128xf32>
    %61 = arith.addf %36, %60 : vector<8x128xf32>
    %62 = vector.extract_strided_slice %32 {offsets = [0, 32], sizes = [8, 32], strides = [1, 1]} : vector<8x128xf32> to vector<8x32xf32>
    %63 = arith.truncf %62 : vector<8x32xf32> to vector<8x32xbf16>
    %64 = vector.extract_strided_slice %33 {offsets = [0, 32], sizes = [8, 32], strides = [1, 1]} : vector<8x128xf32> to vector<8x32xf32>
    %65 = arith.truncf %64 : vector<8x32xf32> to vector<8x32xbf16>
    %66 = vector.extract_strided_slice %34 {offsets = [0, 32], sizes = [8, 32], strides = [1, 1]} : vector<8x128xf32> to vector<8x32xf32>
    %67 = arith.truncf %66 : vector<8x32xf32> to vector<8x32xbf16>
    %cst_26 = arith.constant dense<0.000000e+00> : vector<8x8xf32>
    %68 = tpu.matmul %63, %65, %cst_26 {dimension_numbers = #tpu.dot_dimension_numbers<[1], [1], [0], [0], [0, 0, 1, 0], [], []>} : vector<8x32xbf16>, vector<8x32xbf16>, vector<8x8xf32> -> vector<8x8xf32>
    %cst_27 = arith.constant 0.176776692 : f32
    %69 = vector.broadcast %cst_27 : f32 to vector<8x8xf32>
    %70 = arith.mulf %68, %69 : vector<8x8xf32>
    %71 = arith.addf %70, %35 : vector<8x8xf32>
    %cst_28 = arith.constant dense<0xFF800000> : vector<8xf32>
    %72 = vector.multi_reduction <maximumf>, %71, %cst_28 [1] : vector<8x8xf32> to vector<8xf32>
    %73 = vector.shape_cast %72 : vector<8xf32> to vector<8x1xf32>
    %74 = vector.broadcast %73 : vector<8x1xf32> to vector<8x8xf32>
    %75 = arith.subf %71, %74 : vector<8x8xf32>
    %76 = math.exp %75 : vector<8x8xf32>
    %cst_29 = arith.constant dense<0.000000e+00> : vector<8xf32>
    %77 = vector.multi_reduction <add>, %76, %cst_29 [1] : vector<8x8xf32> to vector<8xf32>
    %78 = vector.shape_cast %77 : vector<8xf32> to vector<8x1xf32>
    %79 = vector.broadcast %78 : vector<8x1xf32> to vector<8x8xf32>
    %80 = arith.divf %76, %79 : vector<8x8xf32>
    %81 = arith.truncf %80 : vector<8x8xf32> to vector<8x8xbf16>
    %cst_30 = arith.constant dense<0.000000e+00> : vector<8x32xf32>
    %82 = tpu.matmul %81, %67, %cst_30 {dimension_numbers = #tpu.dot_dimension_numbers<[1], [0], [0], [1], [0, 0, 1, 1], [], []>} : vector<8x8xbf16>, vector<8x32xbf16>, vector<8x32xf32> -> vector<8x32xf32>
    %83 = arith.truncf %82 : vector<8x32xf32> to vector<8x32xbf16>
    %c32 = arith.constant 32 : index
    %c0_31 = arith.constant 0 : index
    %84 = vector.load %arg6[%c32, %c0_31] : memref<128x128xbf16, #tpu.memory_space<vmem>>, vector<32x128xbf16>
    %cst_32 = arith.constant dense<0.000000e+00> : vector<8x128xf32>
    %85 = tpu.matmul %83, %84, %cst_32 {dimension_numbers = #tpu.dot_dimension_numbers<[1], [0], [0], [1], [0, 0, 1, 1], [], []>} : vector<8x32xbf16>, vector<32x128xbf16>, vector<8x128xf32> -> vector<8x128xf32>
    %86 = arith.addf %61, %85 : vector<8x128xf32>
    %87 = vector.extract_strided_slice %32 {offsets = [0, 64], sizes = [8, 32], strides = [1, 1]} : vector<8x128xf32> to vector<8x32xf32>
    %88 = arith.truncf %87 : vector<8x32xf32> to vector<8x32xbf16>
    %89 = vector.extract_strided_slice %33 {offsets = [0, 64], sizes = [8, 32], strides = [1, 1]} : vector<8x128xf32> to vector<8x32xf32>
    %90 = arith.truncf %89 : vector<8x32xf32> to vector<8x32xbf16>
    %91 = vector.extract_strided_slice %34 {offsets = [0, 64], sizes = [8, 32], strides = [1, 1]} : vector<8x128xf32> to vector<8x32xf32>
    %92 = arith.truncf %91 : vector<8x32xf32> to vector<8x32xbf16>
    %cst_33 = arith.constant dense<0.000000e+00> : vector<8x8xf32>
    %93 = tpu.matmul %88, %90, %cst_33 {dimension_numbers = #tpu.dot_dimension_numbers<[1], [1], [0], [0], [0, 0, 1, 0], [], []>} : vector<8x32xbf16>, vector<8x32xbf16>, vector<8x8xf32> -> vector<8x8xf32>
    %cst_34 = arith.constant 0.176776692 : f32
    %94 = vector.broadcast %cst_34 : f32 to vector<8x8xf32>
    %95 = arith.mulf %93, %94 : vector<8x8xf32>
    %96 = arith.addf %95, %35 : vector<8x8xf32>
    %cst_35 = arith.constant dense<0xFF800000> : vector<8xf32>
    %97 = vector.multi_reduction <maximumf>, %96, %cst_35 [1] : vector<8x8xf32> to vector<8xf32>
    %98 = vector.shape_cast %97 : vector<8xf32> to vector<8x1xf32>
    %99 = vector.broadcast %98 : vector<8x1xf32> to vector<8x8xf32>
    %100 = arith.subf %96, %99 : vector<8x8xf32>
    %101 = math.exp %100 : vector<8x8xf32>
    %cst_36 = arith.constant dense<0.000000e+00> : vector<8xf32>
    %102 = vector.multi_reduction <add>, %101, %cst_36 [1] : vector<8x8xf32> to vector<8xf32>
    %103 = vector.shape_cast %102 : vector<8xf32> to vector<8x1xf32>
    %104 = vector.broadcast %103 : vector<8x1xf32> to vector<8x8xf32>
    %105 = arith.divf %101, %104 : vector<8x8xf32>
    %106 = arith.truncf %105 : vector<8x8xf32> to vector<8x8xbf16>
    %cst_37 = arith.constant dense<0.000000e+00> : vector<8x32xf32>
    %107 = tpu.matmul %106, %92, %cst_37 {dimension_numbers = #tpu.dot_dimension_numbers<[1], [0], [0], [1], [0, 0, 1, 1], [], []>} : vector<8x8xbf16>, vector<8x32xbf16>, vector<8x32xf32> -> vector<8x32xf32>
    %108 = arith.truncf %107 : vector<8x32xf32> to vector<8x32xbf16>
    %c64 = arith.constant 64 : index
    %c0_38 = arith.constant 0 : index
    %109 = vector.load %arg6[%c64, %c0_38] : memref<128x128xbf16, #tpu.memory_space<vmem>>, vector<32x128xbf16>
    %cst_39 = arith.constant dense<0.000000e+00> : vector<8x128xf32>
    %110 = tpu.matmul %108, %109, %cst_39 {dimension_numbers = #tpu.dot_dimension_numbers<[1], [0], [0], [1], [0, 0, 1, 1], [], []>} : vector<8x32xbf16>, vector<32x128xbf16>, vector<8x128xf32> -> vector<8x128xf32>
    %111 = arith.addf %86, %110 : vector<8x128xf32>
    %112 = vector.extract_strided_slice %32 {offsets = [0, 96], sizes = [8, 32], strides = [1, 1]} : vector<8x128xf32> to vector<8x32xf32>
    %113 = arith.truncf %112 : vector<8x32xf32> to vector<8x32xbf16>
    %114 = vector.extract_strided_slice %33 {offsets = [0, 96], sizes = [8, 32], strides = [1, 1]} : vector<8x128xf32> to vector<8x32xf32>
    %115 = arith.truncf %114 : vector<8x32xf32> to vector<8x32xbf16>
    %116 = vector.extract_strided_slice %34 {offsets = [0, 96], sizes = [8, 32], strides = [1, 1]} : vector<8x128xf32> to vector<8x32xf32>
    %117 = arith.truncf %116 : vector<8x32xf32> to vector<8x32xbf16>
    %cst_40 = arith.constant dense<0.000000e+00> : vector<8x8xf32>
    %118 = tpu.matmul %113, %115, %cst_40 {dimension_numbers = #tpu.dot_dimension_numbers<[1], [1], [0], [0], [0, 0, 1, 0], [], []>} : vector<8x32xbf16>, vector<8x32xbf16>, vector<8x8xf32> -> vector<8x8xf32>
    %cst_41 = arith.constant 0.176776692 : f32
    %119 = vector.broadcast %cst_41 : f32 to vector<8x8xf32>
    %120 = arith.mulf %118, %119 : vector<8x8xf32>
    %121 = arith.addf %120, %35 : vector<8x8xf32>
    %cst_42 = arith.constant dense<0xFF800000> : vector<8xf32>
    %122 = vector.multi_reduction <maximumf>, %121, %cst_42 [1] : vector<8x8xf32> to vector<8xf32>
    %123 = vector.shape_cast %122 : vector<8xf32> to vector<8x1xf32>
    %124 = vector.broadcast %123 : vector<8x1xf32> to vector<8x8xf32>
    %125 = arith.subf %121, %124 : vector<8x8xf32>
    %126 = math.exp %125 : vector<8x8xf32>
    %cst_43 = arith.constant dense<0.000000e+00> : vector<8xf32>
    %127 = vector.multi_reduction <add>, %126, %cst_43 [1] : vector<8x8xf32> to vector<8xf32>
    %128 = vector.shape_cast %127 : vector<8xf32> to vector<8x1xf32>
    %129 = vector.broadcast %128 : vector<8x1xf32> to vector<8x8xf32>
    %130 = arith.divf %126, %129 : vector<8x8xf32>
    %131 = arith.truncf %130 : vector<8x8xf32> to vector<8x8xbf16>
    %cst_44 = arith.constant dense<0.000000e+00> : vector<8x32xf32>
    %132 = tpu.matmul %131, %117, %cst_44 {dimension_numbers = #tpu.dot_dimension_numbers<[1], [0], [0], [1], [0, 0, 1, 1], [], []>} : vector<8x8xbf16>, vector<8x32xbf16>, vector<8x32xf32> -> vector<8x32xf32>
    %133 = arith.truncf %132 : vector<8x32xf32> to vector<8x32xbf16>
    %c96 = arith.constant 96 : index
    %c0_45 = arith.constant 0 : index
    %134 = vector.load %arg6[%c96, %c0_45] : memref<128x128xbf16, #tpu.memory_space<vmem>>, vector<32x128xbf16>
    %cst_46 = arith.constant dense<0.000000e+00> : vector<8x128xf32>
    %135 = tpu.matmul %133, %134, %cst_46 {dimension_numbers = #tpu.dot_dimension_numbers<[1], [0], [0], [1], [0, 0, 1, 1], [], []>} : vector<8x32xbf16>, vector<32x128xbf16>, vector<8x128xf32> -> vector<8x128xf32>
    %136 = arith.addf %111, %135 : vector<8x128xf32>
    %137 = arith.addf %1, %136 : vector<8x128xf32>
    %c0_47 = arith.constant 0 : index
    %c0_48 = arith.constant 0 : index
    %138 = vector.load %arg7[%c0_47, %c0_48] : memref<1x128xf32, #tpu.memory_space<vmem>>, vector<1x128xf32>
    %139 = vector.broadcast %138 : vector<1x128xf32> to vector<8x128xf32>
    %140 = arith.addf %137, %139 : vector<8x128xf32>
    %c0_49 = arith.constant 0 : index
    %c0_50 = arith.constant 0 : index
    %141 = vector.load %arg9[%c0_49, %c0_50] : memref<1x128xf32, #tpu.memory_space<vmem>>, vector<1x128xf32>
    %c0_51 = arith.constant 0 : index
    %c0_52 = arith.constant 0 : index
    %142 = vector.load %arg10[%c0_51, %c0_52] : memref<1x128xf32, #tpu.memory_space<vmem>>, vector<1x128xf32>
    %cst_53 = arith.constant dense<0.000000e+00> : vector<8xf32>
    %143 = vector.multi_reduction <add>, %140, %cst_53 [1] : vector<8x128xf32> to vector<8xf32>
    %144 = vector.shape_cast %143 : vector<8xf32> to vector<8x1xf32>
    %cst_54 = arith.constant 1.280000e+02 : f32
    %145 = vector.broadcast %cst_54 : f32 to vector<8x1xf32>
    %146 = arith.divf %144, %145 : vector<8x1xf32>
    %147 = vector.broadcast %146 : vector<8x1xf32> to vector<8x128xf32>
    %148 = arith.subf %140, %147 : vector<8x128xf32>
    %149 = arith.mulf %148, %148 : vector<8x128xf32>
    %cst_55 = arith.constant dense<0.000000e+00> : vector<8xf32>
    %150 = vector.multi_reduction <add>, %149, %cst_55 [1] : vector<8x128xf32> to vector<8xf32>
    %151 = vector.shape_cast %150 : vector<8xf32> to vector<8x1xf32>
    %cst_56 = arith.constant 1.280000e+02 : f32
    %152 = vector.broadcast %cst_56 : f32 to vector<8x1xf32>
    %153 = arith.divf %151, %152 : vector<8x1xf32>
    %cst_57 = arith.constant 9.99999974E-6 : f32
    %154 = vector.broadcast %cst_57 : f32 to vector<8x1xf32>
    %155 = arith.addf %153, %154 : vector<8x1xf32>
    %156 = math.rsqrt %155 : vector<8x1xf32>
    %157 = vector.broadcast %141 : vector<1x128xf32> to vector<8x128xf32>
    %158 = vector.broadcast %156 : vector<8x1xf32> to vector<8x128xf32>
    %159 = arith.mulf %157, %158 : vector<8x128xf32>
    %160 = vector.broadcast %146 : vector<8x1xf32> to vector<8x128xf32>
    %161 = arith.subf %140, %160 : vector<8x128xf32>
    %162 = arith.mulf %161, %159 : vector<8x128xf32>
    %163 = vector.broadcast %142 : vector<1x128xf32> to vector<8x128xf32>
    %164 = arith.addf %162, %163 : vector<8x128xf32>
    %165 = arith.truncf %164 : vector<8x128xf32> to vector<8x128xbf16>
    %c0_58 = arith.constant 0 : index
    %c0_59 = arith.constant 0 : index
    %166 = vector.load %arg11[%c0_58, %c0_59] : memref<128x512xbf16, #tpu.memory_space<vmem>>, vector<128x512xbf16>
    %cst_60 = arith.constant dense<0.000000e+00> : vector<8x512xf32>
    %167 = tpu.matmul %165, %166, %cst_60 {dimension_numbers = #tpu.dot_dimension_numbers<[1], [0], [0], [1], [0, 0, 1, 1], [], []>} : vector<8x128xbf16>, vector<128x512xbf16>, vector<8x512xf32> -> vector<8x512xf32>
    %c0_61 = arith.constant 0 : index
    %c0_62 = arith.constant 0 : index
    %168 = vector.load %arg12[%c0_61, %c0_62] : memref<1x512xf32, #tpu.memory_space<vmem>>, vector<1x512xf32>
    %169 = vector.broadcast %168 : vector<1x512xf32> to vector<8x512xf32>
    %170 = arith.addf %167, %169 : vector<8x512xf32>
    %cst_63 = arith.constant 1.702000e+00 : f32
    %171 = vector.broadcast %cst_63 : f32 to vector<8x512xf32>
    %172 = arith.mulf %171, %170 : vector<8x512xf32>
    %173 = arith.negf %172 : vector<8x512xf32>
    %174 = math.exp %173 : vector<8x512xf32>
    %cst_64 = arith.constant 1.000000e+00 : f32
    %175 = vector.broadcast %cst_64 : f32 to vector<8x512xf32>
    %176 = arith.addf %175, %174 : vector<8x512xf32>
    %177 = arith.divf %175, %176 : vector<8x512xf32>
    %178 = arith.mulf %170, %177 : vector<8x512xf32>
    %179 = arith.truncf %178 : vector<8x512xf32> to vector<8x512xbf16>
    %c0_65 = arith.constant 0 : index
    %c0_66 = arith.constant 0 : index
    %180 = vector.load %arg13[%c0_65, %c0_66] : memref<512x128xbf16, #tpu.memory_space<vmem>>, vector<512x128xbf16>
    %cst_67 = arith.constant dense<0.000000e+00> : vector<8x128xf32>
    %181 = tpu.matmul %179, %180, %cst_67 {dimension_numbers = #tpu.dot_dimension_numbers<[1], [0], [0], [1], [0, 0, 1, 1], [], []>} : vector<8x512xbf16>, vector<512x128xbf16>, vector<8x128xf32> -> vector<8x128xf32>
    %182 = arith.addf %140, %181 : vector<8x128xf32>
    %c0_68 = arith.constant 0 : index
    %c0_69 = arith.constant 0 : index
    %183 = vector.load %arg14[%c0_68, %c0_69] : memref<1x128xf32, #tpu.memory_space<vmem>>, vector<1x128xf32>
    %184 = vector.broadcast %183 : vector<1x128xf32> to vector<8x128xf32>
    %185 = arith.addf %182, %184 : vector<8x128xf32>
    %c0_70 = arith.constant 0 : index
    %c0_71 = arith.constant 0 : index
    %c0_72 = arith.constant 0 : index
    %186 = vector.load %arg15[%c0_70, %c0_71, %c0_72] : memref<1x8x128xf32, #tpu.memory_space<vmem>>, vector<1x8x128xf32>
    %187 = vector.shape_cast %186 : vector<1x8x128xf32> to vector<8x128xf32>
    %188 = vector.shape_cast %185 : vector<8x128xf32> to vector<1x8x128xf32>
    tpu.vector_store %arg15[%c0_70, %c0_71, %c0_72], %188 {strides = array<i32>} : memref<1x8x128xf32, #tpu.memory_space<vmem>>, vector<1x8x128xf32>,
    return
  }
  func.func @transform_0(%arg0: i32) -> (i32, i32, i32) {
    %c0_i32 = arith.constant 0 : i32
    %c0_i32_0 = arith.constant 0 : i32
    %c0_i32_1 = arith.constant 0 : i32
    return %arg0, %c0_i32, %c0_i32_0 : i32, i32, i32
  }
  func.func @transform_1(%arg0: i32) -> (i32, i32) {
    %c0_i32 = arith.constant 0 : i32
    %c0_i32_0 = arith.constant 0 : i32
    %c0_i32_1 = arith.constant 0 : i32
    return %c0_i32, %c0_i32_0 : i32, i32
  }
  func.func @transform_2(%arg0: i32) -> (i32, i32) {
    %c0_i32 = arith.constant 0 : i32
    %c0_i32_0 = arith.constant 0 : i32
    %c0_i32_1 = arith.constant 0 : i32
    return %c0_i32, %c0_i32_0 : i32, i32
  }
  func.func @transform_3(%arg0: i32) -> (i32, i32) {
    %c0_i32 = arith.constant 0 : i32
    %c0_i32_0 = arith.constant 0 : i32
    %c0_i32_1 = arith.constant 0 : i32
    return %c0_i32, %c0_i32_0 : i32, i32
  }
  func.func @transform_4(%arg0: i32) -> (i32, i32) {
    %c0_i32 = arith.constant 0 : i32
    %c0_i32_0 = arith.constant 0 : i32
    %c0_i32_1 = arith.constant 0 : i32
    return %c0_i32, %c0_i32_0 : i32, i32
  }
  func.func @transform_5(%arg0: i32) -> (i32, i32) {
    %c0_i32 = arith.constant 0 : i32
    %c0_i32_0 = arith.constant 0 : i32
    %c0_i32_1 = arith.constant 0 : i32
    return %c0_i32, %c0_i32_0 : i32, i32
  }
  func.func @transform_6(%arg0: i32) -> (i32, i32) {
    %c0_i32 = arith.constant 0 : i32
    %c0_i32_0 = arith.constant 0 : i32
    %c0_i32_1 = arith.constant 0 : i32
    return %c0_i32, %c0_i32_0 : i32, i32
  }
  func.func @transform_7(%arg0: i32) -> (i32, i32) {
    %c0_i32 = arith.constant 0 : i32
    %c0_i32_0 = arith.constant 0 : i32
    %c0_i32_1 = arith.constant 0 : i32
    return %c0_i32, %c0_i32_0 : i32, i32
  }
  func.func @transform_8(%arg0: i32) -> (i32, i32) {
    %c0_i32 = arith.constant 0 : i32
    %c0_i32_0 = arith.constant 0 : i32
    %c0_i32_1 = arith.constant 0 : i32
    return %c0_i32, %c0_i32_0 : i32, i32
  }
  func.func @transform_9(%arg0: i32) -> (i32, i32) {
    %c0_i32 = arith.constant 0 : i32
    %c0_i32_0 = arith.constant 0 : i32
    %c0_i32_1 = arith.constant 0 : i32
    return %c0_i32, %c0_i32_0 : i32, i32
  }
  func.func @transform_10(%arg0: i32) -> (i32, i32) {
    %c0_i32 = arith.constant 0 : i32
    %c0_i32_0 = arith.constant 0 : i32
    %c0_i32_1 = arith.constant 0 : i32
    return %c0_i32, %c0_i32_0 : i32, i32
  }
  func.func @transform_11(%arg0: i32) -> (i32, i32) {
    %c0_i32 = arith.constant 0 : i32
    %c0_i32_0 = arith.constant 0 : i32
    %c0_i32_1 = arith.constant 0 : i32
    return %c0_i32, %c0_i32_0 : i32, i32
  }
  func.func @transform_12(%arg0: i32) -> (i32, i32) {
    %c0_i32 = arith.constant 0 : i32
    %c0_i32_0 = arith.constant 0 : i32
    %c0_i32_1 = arith.constant 0 : i32
    return %c0_i32, %c0_i32_0 : i32, i32
  }
  func.func @transform_13(%arg0: i32) -> (i32, i32) {
    %c0_i32 = arith.constant 0 : i32
    %c0_i32_0 = arith.constant 0 : i32
    %c0_i32_1 = arith.constant 0 : i32
    return %c0_i32, %c0_i32_0 : i32, i32
  }
  func.func @transform_14(%arg0: i32) -> (i32, i32, i32) {
    %c0_i32 = arith.constant 0 : i32
    %c0_i32_0 = arith.constant 0 : i32
    %c0_i32_1 = arith.constant 0 : i32
    return %arg0, %c0_i32, %c0_i32_0 : i32, i32, i32
  }
}

</mosaic_0001>

<bundles_post_ra>
// kernel: tpu_custom_call.1
= control target key start
LH: loop header
LB: loop body
LE: loop exit
PB: predicated region body
PF: predicated region fallthrough
CT: control target
= control target key end

     0   :  { %s3867_s0 = inlined_call_operand.hbm [shape: f32[2,8,128], index: 0, kind: input, shape index: {}]   ;;  %s3868_s1 = inlined_call_operand.hbm [shape: f32[1,128], index: 1, kind: input, shape index: {}]   ;;  %s3869_s2 = inlined_call_operand.hbm [shape: f32[1,128], index: 2, kind: input, shape index: {}]   ;;  %s3870_s3 = inlined_call_operand.hbm [shape: bf16[128,384], index: 3, kind: input, shape index: {}]   ;;  %s3871_s4 = inlined_call_operand.vmem [shape: f32[1,384], index: 4, kind: input, shape index: {}]   ;;  %s3872_s5 = inlined_call_operand.hbm [shape: bf16[128,128], index: 5, kind: input, shape index: {}]   ;;  %s3873_s6 = inlined_call_operand.vmem [shape: f32[1,128], index: 6, kind: input, shape index: {}]   ;;  %s3874_s7 = inlined_call_operand.vmem [shape: f32[8,8], index: 7, kind: input, shape index: {}]   ;;  %s3875_s8 = inlined_call_operand.vmem [shape: f32[1,128], index: 8, kind: input, shape index: {}]   ;;  %s3876_s9 = inlined_call_operand.vmem [shape: f32[1,128], index: 9, kind: input, shape index: {}]   ;;  %s3877_s10 = inlined_call_operand.hbm [shape: bf16[128,512], index: 10, kind: input, shape index: {}]   ;;  %s3878_s11 = inlined_call_operand.vmem [shape: f32[1,512], index: 11, kind: input, shape index: {}]   ;;  %s3879_s12 = inlined_call_operand.hbm [shape: bf16[512,128], index: 12, kind: input, shape index: {}]   ;;  %s3880_s13 = inlined_call_operand.vmem [shape: f32[1,128], index: 13, kind: input, shape index: {}]   ;;  %s3881_s14 = inlined_call_operand.hbm [shape: f32[2,8,128], index: 14, kind: output, shape index: {}]  }
   0x1   :  { %3886 = sst [smem:[#allocation20_spill]] %s3868_s1 }
   0x2   :  { %3887 = sst [smem:[#allocation21_spill]] %s3870_s3 }
   0x3   :  { %3888 = sst [smem:[#allocation22_spill]] %s3873_s6 }
   0x4   :  { %3889 = sst [smem:[#allocation23_spill]] %s3875_s8 }
   0x5   :  { %3890 = sst [smem:[#allocation24_spill]] %s3876_s9 }
   0x6   :  { %3891 = sst [smem:[#allocation25_spill]] %s3878_s11 }
   0x7   :  { %3892 = sst [smem:[#allocation26_spill]] %s3880_s13 }
   0x8   :  { %3893 = sst [smem:[#allocation27_spill]] %s3881_s14 }
   0x9   :  { %19 = vsyncpa [#allocation3], 0 }
   0xa   :  { %21 = vsyncpa [#allocation3 + $0x1], 0 }
   0xb   :  { %22 = vsyncpa [#allocation6], 0 }
   0xc   :  { %23 = vsyncpa [#allocation9], 0 }
   0xd   :  { %24 = vsyncpa [#allocation12], 0 }
   0xe   :  { %25 = vsyncpa [#allocation4], 0 }
   0xf   :  { %27 = vsyncpa [#allocation4 + $0x1], 0  ;;  %s3376_s29 = smov 0   ;;  %s3378_s30 = smov 0  }
  0x10   :  { %s3380_s15 = smov 0   ;;  %s3382_s16 = smov 0  }
  0x11 LB: > { %s3281_s17 = smov [#allocation5]   ;;  %s3397_s19 = sadd.s32 4294967295, %s3279_s16   ;;  %s3279_s16 = sphi %s3382_s16, %s3924_s16   ;;  %s3275_s15 = sphi %s3380_s15, %s3923_s15   ;;  %s3271_s30 = sphi %s3378_s30, %s3922_s30   ;;  %s3267_s29 = sphi %s3376_s29, %s3921_s29  }
  0x12   : > { %s376_s18 = sshll.u32 %s3281_s17, 4  ;;  %p2406_p0 = scmp.ge.s32.totalorder %s3279_s16, 1  ;;  %s3402_s18 = int_to_ptr.vmem [resolvable:$true] %s376_s18 }
  0x13   : > { %p3883_p1 = scmp.eq.s32.totalorder %s3397_s19, 0  ;;  %p363_p2 = scmp.lt.s32.totalorder %s3279_s16, 3 }
  0x14   : > { %s3282_s21 = smov [#allocation8]   ;;  %s3283_s24 = smov [#allocation11]  }
  0x15   : > { %p3404_p3 = pnand %p2406_p0, %p363_p2  ;;  %s397_s22 = sshll.u32 %s3282_s21, 4  ;;  %s3411_s22 = int_to_ptr.vmem [resolvable:$true] %s397_s22 }
  0x16   : > { %s438_s25 = sshll.u32 %s3283_s24, 4  ;;  %s3896_s1 = sld [smem:[#allocation20_spill]]  ;;  %s3419_s25 = int_to_ptr.vmem [resolvable:$true] %s438_s25 }
  0x17   : > { %s3894_s20 = scalar_select %p3404_p3, 1, 0 }
  0x18   : > { %p2756_p5 = pneg %p3404_p3 }
  0x1a   : > { %p3415_p6 = pnand %p2756_p5, %p3883_p1 }
  0x1c   : > { %s3003_s28 = scalar_lea.hbm %s3896_s1, 16  ;;  %p3429_p8 = pneg %p3415_p6 }
  0x1d   : > { %p3004_p7 = scmp.ne.s32.totalorder %s3896_s1, %s3003_s28  ;;  %p3010_p11 = scmp.lt.u32.totalorder %s3003_s28, %s3896_s1 }
  0x1f   : > { %p3006_p9 = pnand %p3429_p8, %p3004_p7 }
  0x21   : > { %p3007_p10 = pneg %p3006_p9 }
  0x23   : > { %p3012_p12 = pnand %p3010_p11, %p3007_p10 }
  0x25   : > { %3015 = shalt.err (!%p3012_p12)
}
  0x26   : > { %s3016_s14 = scalar_lea.vmem %s3402_s18, 16  ;;  %s3023_s26 = scalar_lea.vmem %s3402_s18, 32 }
  0x27   : > { %p3017_p13 = scmp.ne.s32.totalorder %s3402_s18, %s3016_s14  ;;  %p3024_p5 = scmp.lt.s32.totalorder %s3402_s18, %s3402_s18 }
  0x28   : > { %p3025_p7 = scmp.lt.s32.totalorder %s3023_s26, %s3016_s14 }
  0x29   : > { %p3019_p0 = pnand %p3017_p13, %p3429_p8 }
  0x2a   : > { %p3026_p9 = por %p3025_p7, %p3024_p5 }
  0x2b   : > { %p3020_p2 = pneg %p3019_p0 }
  0x2d   : > { %p3027_p4 = pnand %p3026_p9, %p3020_p2 }
  0x2f   : > { %3030 = shalt.err (!%p3027_p4)
}
  0x30   : > { %2759 = dma.hbm_to_vmem [thread:$0]  (!%p3415_p6), %s3896_s1, 16, %s3402_s18, [#allocation6]  }
  0x31   : > { %s3898_s3 = sld [smem:[#allocation21_spill]] }
  0x37   : > { %s3031_s24 = scalar_lea.hbm %s3898_s3, 3072 }
  0x38   : > { %p3032_p10 = scmp.ne.s32.totalorder %s3898_s3, %s3031_s24  ;;  %p3038_p4 = scmp.lt.u32.totalorder %s3031_s24, %s3898_s3 }
  0x3a   : > { %p3034_p11 = pnand %p3032_p10, %p3429_p8 }
  0x3c   : > { %p3035_p12 = pneg %p3034_p11 }
  0x3e   : > { %p3040_p13 = pnand %p3038_p4, %p3035_p12 }
  0x40   : > { %3043 = shalt.err (!%p3040_p13)
}
  0x41   : > { %s3044_s18 = scalar_lea.vmem %s3411_s22, 3072  ;;  %p3052_p7 = scmp.lt.s32.totalorder %s3411_s22, %s3411_s22 }
  0x42   : > { %p3045_p0 = scmp.ne.s32.totalorder %s3411_s22, %s3044_s18  ;;  %p3053_p9 = scmp.lt.s32.totalorder %s3044_s18, %s3044_s18 }
  0x44   : > { %p3047_p2 = pnand %p3045_p0, %p3429_p8  ;;  %p3054_p10 = por %p3053_p9, %p3052_p7 }
  0x46   : > { %p3048_p5 = pneg %p3047_p2 }
  0x48   : > { %p3055_p11 = pnand %p3054_p10, %p3048_p5 }
  0x4a   : > { %3058 = shalt.err (!%p3055_p11)
}
  0x4b   : > { %s3284_s9 = smov 192   ;;  %s3285_s11 = smov 12  }
  0x4c   : > { %2765 = dma.hbm_to_vmem [thread:$0]  (!%p3415_p6), %s3898_s3, 3072, %s3411_s22, [#allocation9], %s3284_s9, %s3284_s9, %s3285_s11  }
  0x4d   : > { %s3059_s24 = scalar_lea.hbm %s3877_s10, 4096 }
  0x4e   : > { %p3060_p12 = scmp.ne.s32.totalorder %s3877_s10, %s3059_s24  ;;  %p3066_p0 = scmp.lt.u32.totalorder %s3059_s24, %s3877_s10 }
  0x50   : > { %p3062_p4 = pnand %p3060_p12, %p3429_p8 }
  0x52   : > { %p3063_p13 = pneg %p3062_p4 }
  0x54   : > { %p3068_p2 = pnand %p3066_p0, %p3063_p13 }
  0x56   : > { %3071 = shalt.err (!%p3068_p2)
}
  0x57   : > { %s3072_s22 = scalar_lea.vmem %s3419_s25, 4096  ;;  %p3080_p10 = scmp.lt.s32.totalorder %s3419_s25, %s3419_s25 }
  0x58   : > { %p3073_p5 = scmp.ne.s32.totalorder %s3419_s25, %s3072_s22  ;;  %p3081_p11 = scmp.lt.s32.totalorder %s3072_s22, %s3072_s22 }
  0x5a   : > { %p3075_p7 = pnand %p3073_p5, %p3429_p8  ;;  %p3082_p12 = por %p3081_p11, %p3080_p10 }
  0x5c   : > { %p3076_p9 = pneg %p3075_p7 }
  0x5e   : > { %p3083_p4 = pnand %p3082_p12, %p3076_p9 }
  0x60   : > { %3086 = shalt.err (!%p3083_p4)
}
  0x61   : > { %s3286_s9 = smov 256   ;;  %s3287_s1 = smov 16  }
  0x62   : > { %2771 = dma.hbm_to_vmem [thread:$0]  (!%p3415_p6), %s3877_s10, 4096, %s3419_s25, [#allocation12], %s3286_s9, %s3286_s9, %s3287_s1  }
  0x63   : > { %s3288_s27 = smov [#allocation7]   ;;  %s3289_s17 = smov [#allocation10]  }
  0x64   : > { %s387_s28 = sshll.u32 %s3288_s27, 4  ;;  %s413_s24 = sshll.u32 %s3289_s17, 4  ;;  %s388_s28 = int_to_ptr.vmem [resolvable:$true] %s387_s28  ;;  %s414_s24 = int_to_ptr.vmem [resolvable:$true] %s413_s24 }
  0x65   : > { %s3087_s18 = scalar_lea.hbm %s3869_s2, 16 }
  0x66   : > { %p3088_p13 = scmp.ne.s32.totalorder %s3869_s2, %s3087_s18  ;;  %p3094_p5 = scmp.lt.u32.totalorder %s3087_s18, %s3869_s2 }
  0x68   : > { %p3090_p0 = pnand %p3088_p13, %p3429_p8 }
  0x6a   : > { %p3091_p2 = pneg %p3090_p0 }
  0x6c   : > { %p3096_p7 = pnand %p3094_p5, %p3091_p2 }
  0x6e   : > { %3099 = shalt.err (!%p3096_p7)
}
  0x6f   : > { %s3100_s25 = scalar_lea.vmem %s388_s28, 16  ;;  %s3107_s9 = scalar_lea.vmem %s388_s28, 32 }
  0x70   : > { %p3101_p9 = scmp.ne.s32.totalorder %s388_s28, %s3100_s25  ;;  %p3108_p12 = scmp.lt.s32.totalorder %s388_s28, %s388_s28 }
  0x71   : > { %p3109_p4 = scmp.lt.s32.totalorder %s3107_s9, %s3100_s25 }
  0x72   : > { %p3103_p10 = pnand %p3101_p9, %p3429_p8 }
  0x73   : > { %p3110_p1 = por %p3109_p4, %p3108_p12 }
  0x74   : > { %p3104_p11 = pneg %p3103_p10 }
  0x76   : > { %p3111_p3 = pnand %p3110_p1, %p3104_p11 }
  0x78   : > { %3114 = shalt.err (!%p3111_p3)
}
  0x79   : > { %2762 = dma.hbm_to_vmem [thread:$0]  (!%p3415_p6), %s3869_s2, 16, %s388_s28, [#allocation6]  }
  0x7a   : > { %s3115_s11 = scalar_lea.hbm %s3872_s5, 1024 }
  0x7b   : > { %p3116_p13 = scmp.ne.s32.totalorder %s3872_s5, %s3115_s11  ;;  %p3122_p3 = scmp.lt.u32.totalorder %s3115_s11, %s3872_s5 }
  0x7d   : > { %p3118_p0 = pnand %p3116_p13, %p3429_p8 }
  0x7f   : > { %p3119_p1 = pneg %p3118_p0 }
  0x81   : > { %p3124_p2 = pnand %p3122_p3, %p3119_p1 }
  0x83   : > { %3127 = shalt.err (!%p3124_p2)
}
  0x84   : > { %s3128_s26 = scalar_lea.vmem %s414_s24, 1024  ;;  %p3136_p10 = scmp.lt.s32.totalorder %s414_s24, %s414_s24 }
  0x85   : > { %p3129_p5 = scmp.ne.s32.totalorder %s414_s24, %s3128_s26  ;;  %p3137_p11 = scmp.lt.s32.totalorder %s3128_s26, %s3128_s26 }
  0x87   : > { %p3131_p7 = pnand %p3129_p5, %p3429_p8  ;;  %p3138_p12 = por %p3137_p11, %p3136_p10 }
  0x89   : > { %p3132_p9 = pneg %p3131_p7 }
  0x8b   : > { %p3139_p4 = pnand %p3138_p12, %p3132_p9 }
  0x8d   : > { %3142 = shalt.err (!%p3139_p4)
}
  0x8e   : > { %s3290_s28 = smov 64   ;;  %s3291_s18 = smov 4  }
  0x8f   : > { %2768 = dma.hbm_to_vmem [thread:$0]  (!%p3415_p6), %s3872_s5, 1024, %s414_s24, [#allocation9], %s3290_s28, %s3290_s28, %s3291_s18  }
  0x90   : > { %s3292_s9 = smov [#allocation13]   ;;  %s3143_s8 = scalar_lea.hbm %s3879_s12, 4096 }
  0x91   : > { %s454_s3 = sshll.u32 %s3292_s9, 4  ;;  %p3144_p13 = scmp.ne.s32.totalorder %s3879_s12, %s3143_s8  ;;  %s455_s3 = int_to_ptr.vmem [resolvable:$true] %s454_s3 }
  0x92   : > { %p3150_p3 = scmp.lt.u32.totalorder %s3143_s8, %s3879_s12 }
  0x93   : > { %p3146_p0 = pnand %p3144_p13, %p3429_p8 }
  0x95   : > { %p3147_p1 = pneg %p3146_p0 }
  0x97   : > { %p3152_p2 = pnand %p3150_p3, %p3147_p1 }
  0x99   : > { %3155 = shalt.err (!%p3152_p2)
}
  0x9a   : > { %s3156_s24 = scalar_lea.vmem %s455_s3, 4096  ;;  %p3164_p10 = scmp.lt.s32.totalorder %s455_s3, %s455_s3 }
  0x9b   : > { %p3157_p5 = scmp.ne.s32.totalorder %s455_s3, %s3156_s24  ;;  %p3165_p11 = scmp.lt.s32.totalorder %s3156_s24, %s3156_s24 }
  0x9d   : > { %p3159_p7 = pnand %p3157_p5, %p3429_p8  ;;  %p3166_p12 = por %p3165_p11, %p3164_p10 }
  0x9f   : > { %p3160_p9 = pneg %p3159_p7 }
  0xa1   : > { %p3167_p4 = pnand %p3166_p12, %p3160_p9 }
  0xa3   : > { %3170 = shalt.err (!%p3167_p4)
}
  0xa4   : > { %2774 = dma.hbm_to_vmem [thread:$0]  (!%p3415_p6), %s3879_s12, 4096, %s455_s3, [#allocation12], %s3290_s28, %s3290_s28, %s3291_s18  }
  0xa5   : > { %s2405_s21 = sadd.s32 4294967294, %s3279_s16   ;;  %s3553_s23 = sadd.s32 1, %s3279_s16  }
  0xa6   : > { %s37_s22 = ssub.s32 %s3279_s16, %s3553_s23  ;;  %s40_s25 = sadd.s32 1, %s3275_s15 }
  0xa7   : > { %p38_p8 = scmp.eq.s32.totalorder %s37_s22, 0  ;;  %p47_p13 = scmp.ne.s32.totalorder %s3275_s15, %s3271_s30 }
  0xa8   : > { %p48_p0 = scmp.eq.s32.totalorder %s3279_s16, 0  ;;  %p53_p1 = scmp.ne.s32.totalorder %s3271_s30, %s3267_s29 }
  0xa9   : > { %s3564_s9 = scalar_select %p38_p8, %s3275_s15, %s40_s25  }
  0xaa   : > { %p3566_p3 = por %p48_p0, %p47_p13  ;;  %p3900_p2 = scmp.eq.s32.totalorder %s3397_s19, 0 }
  0xab   : > { %p350_p5 = scmp.eq.s32.totalorder %s3397_s19, 1  ;;  %p356_p7 = scmp.eq.s32.totalorder %s2405_s21, 1 }
  0xac   : > { %p3572_p6 = por %p3900_p2, %p53_p1  ;;  %p2789_p9 = scmp.lt.s32.totalorder %s3279_s16, 2 }
  0xad   : > { %s471_s18 = sand.u32 1, %s3275_s15   ;;  %p3579_p10 = por %p350_p5, %p47_p13 }
  0xae   : > { %p3583_p11 = por %p356_p7, %p53_p1  ;;  %s2414_s8 = sshll.u32 %s471_s18, 3 }
  0xaf   : > { %s3902_s3 = scalar_select %p3579_p10, 1, 0 }
  0xb0   : > { %s3903_s6 = scalar_select %p3583_p11, 1, 0 }
  0xb1   : > { %s2415_s11 = sshll.u32 %s3279_s16, 7  ;;  %s475_s24 = scalar_lea.vmem [#allocation2], %s2414_s8 }
  0xb2   : > { %s3591_s17 = scalar_lea.hbm %s3867_s0, %s2415_s11  ;;  %s482_s14 = sshll.u32 %s475_s24, 4  ;;  %s3593_s14 = int_to_ptr.vmem [resolvable:$true] %s482_s14 }
  0xb3   : > { %p3597_p12 = pnand %p2789_p9, %p3566_p3  ;;  %s472_s21 = scalar_lea.sflag [#allocation3], %s471_s18 }
  0xb4   : > { %s3171_s22 = scalar_lea.hbm %s3591_s17, 128  ;;  %s3176_s11 = scalar_lea.hbm %s3867_s0, 256 }
  0xb5   : > { %p3172_p4 = scmp.ne.s32.totalorder %s3591_s17, %s3171_s22  ;;  %p3173_p8 = pneg %p3597_p12 }
  0xb6   : > { %p3177_p1 = scmp.lt.u32.totalorder %s3591_s17, %s3867_s0  ;;  %p3178_p3 = scmp.lt.u32.totalorder %s3176_s11, %s3171_s22 }
  0xb7   : > { %p3174_p13 = pnand %p3173_p8, %p3172_p4  ;;  %p3180_p5 = scmp.lt.u32.totalorder %s3171_s22, %s3591_s17 }
  0xb8   : > { %p3179_p2 = por %p3178_p3, %p3177_p1 }
  0xb9   : > { %p3175_p0 = pneg %p3174_p13 }
  0xba   : > { %p3181_p7 = por %p3180_p5, %p3179_p2 }
  0xbc   : > { %p3182_p9 = pnand %p3181_p7, %p3175_p0 }
  0xbe   : > { %3185 = shalt.err (!%p3182_p9)
}
  0xbf   : > { %s3186_s18 = scalar_lea.vmem %s3593_s14, 128  ;;  %s3293_s27 = smov [#allocation2]  }
  0xc0   : > { %p3187_p4 = scmp.ne.s32.totalorder %s3593_s14, %s3186_s18  ;;  %s3191_s24 = sshll.u32 %s3293_s27, 4  ;;  %s3192_s24 = int_to_ptr.vmem [resolvable:$false] %s3191_s24 }
  0xc1   : > { %s3193_s25 = scalar_lea.vmem %s3192_s24, 256  ;;  %p3194_p10 = scmp.lt.s32.totalorder %s3593_s14, %s3192_s24 }
  0xc2   : > { %p3189_p13 = pnand %p3187_p4, %p3173_p8  ;;  %p3195_p1 = scmp.lt.s32.totalorder %s3193_s25, %s3186_s18 }
  0xc4   : > { %p3190_p11 = pneg %p3189_p13  ;;  %p3196_p3 = por %p3195_p1, %p3194_p10 }
  0xc6   : > { %p3197_p2 = pnand %p3196_p3, %p3190_p11 }
  0xc8   : > { %3200 = shalt.err (!%p3197_p2)
}
  0xc9   : > { %2778 = dma.hbm_to_vmem [thread:$0]  (!%p3597_p12), %s3591_s17, 128, %s3593_s14, %s472_s21  }
  0xca   : > { %p3905_p0 = scmp.ne.s32.totalorder %s3894_s20, 0 }
  0xcb   : > { %s3629_s22 = sand.u32 (!%p3905_p0), 1, %s3271_s30  }
  0xcc   : > { %491 = sbr.rel (%p3905_p0) target bundleno = 3932 (0xf5c), region = 76  ;;  %s2417_s8 = sshll.u32 (!%p3905_p0), %s3629_s22, 3 }
  0xcd   : > { %s494_s11 = scalar_lea.sflag (!%p3905_p0), [#allocation3], %s3629_s22  ;;  %s497_s1 = scalar_lea.vmem (!%p3905_p0), [#allocation2], %s2417_s8 }
  0xd3   : > { %3246 = dma.done.wait (%p3572_p6), %s494_s11, 128  }
  0xd4   : > { %3248 = vsyncadd (%p3572_p6), %s494_s11, 4294967168  ;;  %p3906_p10 = scmp.eq.s32.totalorder %s3397_s19, 0 }
  0xd6   : > { %3250 = dma.done.wait (%p3906_p10), [#allocation6], 32   ;;  %p3907_p11 = pmov %p3906_p10 }
  0xd7   : > { %p3908_p12 = pmov %p3906_p10 }
  0xd8   : > { %3252 = vsyncadd (%p3907_p11), [#allocation6], 4294967264 }
  0xd9   : > { %3254 = dma.done.wait (%p3908_p12), [#allocation9], 4096   ;;  %p3909_p8 = pmov %p3906_p10 }
  0xdb   : > { %3256 = vsyncadd (%p3909_p8), [#allocation9], 4294963200  ;;  %p3910_p5 = pmov %p3909_p8 }
  0xdd   : > { %3258 = dma.done.wait (%p3910_p5), [#allocation12], 8192   ;;  %p3911_p7 = pmov %p3910_p5 }
  0xde   : > { %v3651_v0 = vld [vmem:[%s497_s1] sm:$0xff]  ;;  %v3294_v3 = vmov 0.0   ;;  %v2851_v5 = vld [vmem:[#allocation8 + $0x1c] ss:$12 sps:$4 sm:$0xff]   ;;  %v3295_v25 = vmov 0   ;;  %vm3296_vm0 = vmmov 0   ;;  %v631_v41 = vlaneseq }
  0xdf   : > { %3260 = vsyncadd (%p3911_p7), [#allocation12], 4294959104  ;;  %570 = vadd.xlane.f32.xlu0 %v3651_v0  ;;  %v2847_v1 = vld [vmem:[#allocation8 + $0x4] ss:$12 sps:$4 sm:$0xff]   ;;  %v2849_v2 = vld [vmem:[#allocation8] ss:$12 sps:$4 sm:$0xff]   ;;  %2628 = vmatprep.subr.bf16.mxu1 %v3294_v3 }
  0xe0   : > { %v2850_v4 = vld [vmem:[#allocation8 + $0x8] ss:$12 sps:$4 sm:$0xff]   ;;  %v2853_v6 = vld [vmem:[#allocation8 + $0x18] ss:$12 sps:$4 sm:$0xff]   ;;  %774 = vmatprep.subr.bf16.mxu0 %v2847_v1  ;;  %v2854_v7 = vld [vmem:[#allocation8 + $0x20] ss:$12 sps:$4 sm:$0xff]   ;;  %806 = vmatprep.mubr.bf16.mxu0 %v3295_v25 }
  0xe1   : > { %v2855_v8 = vld [vmem:[#allocation8 + $0x34] ss:$12 sps:$4 sm:$0xff]   ;;  %775 = vmatpush1.bf16.msra.mxu0 %v2849_v2  ;;  %2629 = vmatpush3.bf16.msra.mxu1 %v2850_v4  ;;  %v2857_v13 = vld [vmem:[#allocation8 + $0x30] ss:$12 sps:$4 sm:$0xff]   ;;  %v2858_v14 = vld [vmem:[#allocation8 + $0x38] ss:$12 sps:$4 sm:$0xff]  }
  0xe2   : > { %776 = vmatprep.subr.bf16.mxu0 %v2851_v5  ;;  %2630 = vmatprep.subr.bf16.mxu1 %v3294_v3  ;;  %v2859_v15 = vld [vmem:[#allocation8 + $0x4c] ss:$12 sps:$4 sm:$0xff]   ;;  %v2861_v16 = vld [vmem:[#allocation8 + $0x48] ss:$12 sps:$4 sm:$0xff]   ;;  %v2862_v17 = vld [vmem:[#allocation8 + $0x50] ss:$12 sps:$4 sm:$0xff]  }
  0xe3   : > { %v2863_v18 = vld [vmem:[#allocation8 + $0x64] ss:$12 sps:$4 sm:$0xff]   ;;  %v2865_v19 = vld [vmem:[#allocation8 + $0x60] ss:$12 sps:$4 sm:$0xff]   ;;  %v2866_v20 = vld [vmem:[#allocation8 + $0x68] ss:$12 sps:$4 sm:$0xff]   ;;  %2644 = vmatprep.mubr.msk.bf16.mxu1 %vm3296_vm0, %v3294_v3 }
  0xe4   : > { %v2867_v21 = vld [vmem:[#allocation8 + $0x7c] ss:$12 sps:$4 sm:$0xff]   ;;  %v2869_v22 = vld [vmem:[#allocation8 + $0x78] ss:$12 sps:$4 sm:$0xff]   ;;  %v2870_v23 = vld [vmem:[#allocation8 + $0x80] ss:$12 sps:$4 sm:$0xff]  }
  0xe5   : > { %777 = vmatpush1.bf16.msra.mxu0 %v2853_v6  ;;  %2631 = vmatpush3.bf16.msra.mxu1 %v2854_v7  ;;  %v2871_v24 = vld [vmem:[#allocation8 + $0x94] ss:$12 sps:$4 sm:$0xff]   ;;  %v2873_v26 = vld [vmem:[#allocation8 + $0x90] ss:$12 sps:$4 sm:$0xff]   ;;  %v2874_v27 = vld [vmem:[#allocation8 + $0x98] ss:$12 sps:$4 sm:$0xff]  }
  0xe6   : > { %778 = vmatprep.subr.bf16.mxu0 %v2855_v8  ;;  %2632 = vmatprep.subr.bf16.mxu1 %v3294_v3  ;;  %v2875_v28 = vld [vmem:[#allocation8 + $0xac] ss:$12 sps:$4 sm:$0xff]   ;;  %v2877_v29 = vld [vmem:[#allocation8 + $0xa8] ss:$12 sps:$4 sm:$0xff]   ;;  %v2878_v30 = vld [vmem:[#allocation8 + $0xb0] ss:$12 sps:$4 sm:$0xff]  }
  0xe7   : > { %v2425_v34 = vld [vmem:[#allocation5] ss:$0 sm:$0xff]  ;;  %v2426_v37 = vld [vmem:[#allocation7] ss:$0 sm:$0xff]  ;;  %v3672_v42 = vshrl.u32 %v631_v41, 7  ;;  %vm924_vm1 = vcmask 1043456  }
  0xe8   : > { %v629_v44 = vld [vmem:[%s3871_s4] sm:$0x7]  ;;  %vm859_vm2 = vcmask 261120   ;;  %s3297_s17 = smov 96   ;;  %vm908_vm3 = vcmask 64512   ;;  %s3298_s21 = smov 64  }
  0xe9   : > { %779 = vmatpush1.bf16.msra.mxu0 %v2857_v13  ;;  %2633 = vmatpush3.bf16.msra.mxu1 %v2858_v14  ;;  %v641_v43 = vsub.s32 2, %v3672_v42  ;;  %v637_v45 = vsub.s32 1, %v3672_v42  ;;  %v633_v46 = vsub.s32 0, %v3672_v42  ;;  %v3714_v8 = vld [vmem:[%s3874_s7] sm:$0xff]  ;;  %s3299_s13 = smov 32   ;;  %s3912_s24 = sld [smem:[#allocation22_spill]] }
  0xea   : > { %2634 = vmatprep.subr.bf16.mxu1 %v3294_v3  ;;  %780 = vmatprep.subr.bf16.mxu0 %v2859_v15  ;;  %s3913_s1 = sld [smem:[#allocation23_spill]]  ;;  %s3916_s27 = sld [smem:[#allocation26_spill]] }
  0xeb   : > { %v642_v47 = vrot.slane %v629_v44, %v641_v43  ;;  %v638_v48 = vrot.slane %v629_v44, %v637_v45  ;;  %v634_v49 = vrot.slane %v629_v44, %v633_v46  ;;  %s565_s25 = scalar_lea.vmem [#allocation14], %s2417_s8  ;;  %s3917_s28 = sld [smem:[#allocation27_spill]] }
  0xec   : > { %s2278_s11 = sshll.u32 %s565_s25, 4  ;;  %s2265_s14 = scalar_lea.sflag [#allocation4], %s3629_s22  ;;  %s3825_s11 = int_to_ptr.vmem [resolvable:$true] %s2278_s11 }
  0xed   : > { %781 = vmatpush1.bf16.msra.mxu0 %v2861_v16  ;;  %2635 = vmatpush3.bf16.msra.mxu1 %v2862_v17  ;;  %s3201_s26 = scalar_lea.vmem %s3825_s11, 128  ;;  %p3918_p9 = scmp.ne.s32.totalorder %s3902_s3, 0 }
  0xee   : > { %2636 = vmatprep.subr.bf16.mxu1 %v3294_v3  ;;  %782 = vmatprep.subr.bf16.mxu0 %v2863_v18  ;;  %p3202_p6 = scmp.ne.s32.totalorder %s3825_s11, %s3201_s26 }
  0xf0   : > { %p3203_p4 = pnand %p3202_p6, %p3918_p9 }
  0xf1   : > { %783 = vmatpush1.bf16.msra.mxu0 %v2865_v19  ;;  %2637 = vmatpush3.bf16.msra.mxu1 %v2866_v20 }
  0xf2   : > { %784 = vmatprep.subr.bf16.mxu0 %v2867_v21  ;;  %2638 = vmatprep.subr.bf16.mxu1 %v3294_v3  ;;  %p3204_p13 = pneg %p3203_p4 }
  0xf5   : > { %785 = vmatpush1.bf16.msra.mxu0 %v2869_v22  ;;  %2639 = vmatpush3.bf16.msra.mxu1 %v2870_v23 }
  0xf6   : > { %786 = vmatprep.subr.bf16.mxu0 %v2871_v24  ;;  %2640 = vmatprep.subr.bf16.mxu1 %v3294_v3 }
  0xf9   : > { %787 = vmatpush1.bf16.msra.mxu0 %v2873_v26  ;;  %2641 = vmatpush3.bf16.msra.mxu1 %v2874_v27 }
  0xfa   : > { %788 = vmatprep.subr.bf16.mxu0 %v2875_v28  ;;  %2642 = vmatprep.subr.bf16.mxu1 %v3294_v3 }
  0xfd   : > { %789 = vmatpush1.bf16.msra.mxu0 %v2877_v29  ;;  %2643 = vmatpush3.bf16.msra.mxu1 %v2878_v30 }
  0xfe   : > { %2654 = vmatprep.subr.bf16.mxu1 %v3294_v3  ;;  %2648 = vmatprep.subr.bf16.mxu0 %v3294_v3 }
 0x16c   : > { %v571_v9 = vpop.xlane.xlu0 %570 }
 0x16d   : > { %v573_v10 = vmul.f32 0.0078125, %v571_v9 }
 0x16f   : > { %v574_v11 = vsub.f32 %v3651_v0, %v573_v10 }
 0x171   : > { %v575_v12 = vmul.f32 %v574_v11, %v574_v11 }
 0x173   : > { %576 = vadd.xlane.f32.xlu0 %v575_v12 }
 0x200   : > { %v577_v31 = vpop.xlane.xlu0 %576 }
 0x201   : > { %v578_v32 = vmul.f32 0.0078125, %v577_v31 }
 0x203   : > { %v579_v33 = vadd.f32 1e-05, %v578_v32 }
 0x205   : > { %2967 = vrsqrt.f32 %v579_v33 }
 0x20f   : > { %v2968_v35 = vpop.eup %2967 }
 0x210   : > { %v587_v36 = vmul.f32 %v2968_v35, %v2425_v34 }
 0x212   : > { %v588_v38 = vmul.f32 %v587_v36, %v574_v11 }
 0x214   : > { %v595_v39 = vadd.f32 %v2426_v37, %v588_v38  ;;  %v2881_v37 = vld [vmem:[#allocation10 + $0x10] sm:$0xff]   ;;  %v2882_v38 = vld [vmem:[#allocation10 + $0x18] sm:$0xff]  }
 0x216   : > { %v596_v40 = vpack.c.bf16 %v595_v39, %v595_v39 }
 0x218   : > { %807 = vmatmul.mubr.bf16.vlgmr.msra.gmra.mrb[0].mxu0 %v596_v40  ;;  %2645 = vmatmul.mubr.bf16.vlgmr.msra.gmra.mrb[0].mxu1 %v596_v40 }
 0x219   : > { %2650 = vmatprep.mubr.msk.bf16.mxu0 %vm3296_vm0, %v3294_v3  ;;  %2656 = vmatprep.mubr.msk.bf16.mxu1 %vm3296_vm0, %v3294_v3 }
 0x2eb   : > { %v808_v50 = vpop.f32.mrb[0].mxu0  ;;  %v849_v51 = vpop.f32.mrb[0].mxu1 }
 0x2ec   : > { %v850_v52 = vadd.f32 %v849_v51, %v642_v47  ;;  %v810_v53 = vpop.f32.mrb[1].mxu0  ;;  %v2646_v54 = vpop.f32.mrb[1].mxu1  ;;  %v809_v61 = vadd.f32 %v808_v50, %v634_v49  ;;  %v2880_v50 = vld [vmem:[#allocation10 + $0x8] sm:$0xff]  }
 0x2ed   : > { %v811_v55 = vadd.f32 %v810_v53, %v638_v48  ;;  %v812_v56 = vpop.f32.mrb[2].mxu0  ;;  %v852_v57 = vpop.f32.mrb[2].mxu1  ;;  %v2879_v48 = vld [vmem:[#allocation10] sm:$0xff]  }
 0x2ee   : > { %v3686_v58 = vpack.c.bf16 %v850_v52, %v850_v52  ;;  %v813_v59 = vpop.f32.mrb[3].mxu0  ;;  %v2647_v60 = vpop.f32.mrb[3].mxu1  ;;  %v3697_v2 = vpack.c.bf16 %v809_v61, %v809_v61 }
 0x2ef   : > { %v3688_v62 = vpack.c.bf16 %v811_v55, %v811_v55 }
 0x2f0   : > { %v926_v63 = vsel %vm924_vm1, %v3686_v58, 0 }
 0x2f1   : > { %2655 = vmatpush3.bf16.msra.mxu1 %v926_v63  ;;  %977 = vrot.lane.b32.xlu1 %v3688_v62, %s3297_s17  ;;  %v864_v1 = vsel %vm859_vm2, %v3688_v62, 0 }
 0x2f2   : > { %2649 = vmatpush3.bf16.xpose.msra.mxu0 %v864_v1  ;;  %2666 = vmatprep.subr.bf16.mxu1 %v3294_v3 }
 0x2f3   : > { %2660 = vmatprep.subr.bf16.mxu0 %v3294_v3 }
 0x2f5   : > { %974 = vrot.lane.b32.xlu1 %v3697_v2, %s3297_s17 }
 0x2f9   : > { %2651 = vmatmul.mubr.msk.bf16.vlgmr.msra.gmra.mrb[4].mxu0 %vm859_vm2, %v3697_v2 }
 0x2fa   : > { %2662 = vmatprep.mubr.msk.bf16.mxu0 %vm3296_vm0, %v3294_v3 }
 0x363   : > { %v978_v4 = vpop.permute.xlu1 %977 }
 0x364   : > { %v983_v5 = vsel %vm859_vm2, %v978_v4, 0 }
 0x365   : > { %2661 = vmatpush3.bf16.xpose.msra.mxu0 %v983_v5 }
 0x366   : > { %2672 = vmatprep.subr.bf16.mxu0 %v3294_v3 }
 0x367   : > { %v975_v6 = vpop.permute.xlu1 %974 }
 0x36c   : > { %2663 = vmatmul.mubr.msk.bf16.vlgmr.msra.gmra.mrb[8].mxu0 %vm859_vm2, %v975_v6 }
 0x36d   : > { %2676 = vmatprep.mubr.msk.bf16.mxu0 %vm3296_vm0, %v3294_v3  ;;  %2673 = vmatpush3.bf16.msra.mxu0 %v2881_v37 }
 0x36e   : > { %2674 = vmatprep.subr.bf16.mxu0 %v3294_v3 }
 0x371   : > { %2675 = vmatpush3.bf16.msra.mxu0 %v2882_v38 }
 0x372   : > { %2688 = vmatprep.subr.bf16.mxu0 %v3294_v3 }
 0x3cc   : > { %v900_v7 = vpop.f32.mrb[4].mxu0 }
 0x3cd   : > { %v906_v9 = vmul.f32 0.17677669, %v900_v7  ;;  %v2652_v10 = vpop.f32.mrb[5].mxu0 }
 0x3ce   : > { %v903_v11 = vpop.f32.mrb[6].mxu0 }
 0x3cf   : > { %v2653_v12 = vpop.f32.mrb[7].mxu0  ;;  %v907_v13 = vadd.f32 %v906_v9, %v3714_v8 }
 0x3d1   : > { %v909_v14 = vsel %vm908_vm3, %v907_v13, -inf }
 0x3d2   : > { %910 = vmax.xlane.f32.xlu0 %v909_v14 }
 0x43f   : > { %v1019_v15 = vpop.f32.mrb[8].mxu0 }
 0x440   : > { %v1025_v16 = vmul.f32 0.17677669, %v1019_v15  ;;  %v2664_v17 = vpop.f32.mrb[9].mxu0 }
 0x441   : > { %v1022_v18 = vpop.f32.mrb[10].mxu0 }
 0x442   : > { %v2665_v19 = vpop.f32.mrb[11].mxu0  ;;  %v1026_v20 = vadd.f32 %v1025_v16, %v3714_v8 }
 0x444   : > { %v1027_v21 = vsel %vm908_vm3, %v1026_v20, -inf }
 0x445   : > { %1028 = vmax.xlane.f32.xlu1 %v1027_v21 }
 0x456   : > { %1203 = vrot.lane.b32.xlu1 %v3697_v2, %s3298_s21 }
 0x45f   : > { %v911_v22 = vpop.xlane.xlu0 %910 }
 0x460   : > { %v912_v23 = vsub.f32 %v907_v13, %v911_v22 }
 0x462   : > { %v913_v24 = vmul.f32 1.442695, %v912_v23 }
 0x464   : > { %2969 = vpow2.f32 %v913_v24 }
 0x46e   : > { %v2970_v26 = vpop.eup %2969 }
 0x46f   : > { %v915_v27 = vsel %vm908_vm3, %v2970_v26, 0.0 }
 0x470   : > { %916 = vadd.xlane.f32.xlu0 %v915_v27 }
 0x4d2   : > { %v1029_v28 = vpop.xlane.xlu1 %1028 }
 0x4d3   : > { %v1030_v29 = vsub.f32 %v1026_v20, %v1029_v28 }
 0x4d5   : > { %v1031_v30 = vmul.f32 1.442695, %v1030_v29 }
 0x4d6   : > { %v1204_v4 = vpop.permute.xlu1 %1203 }
 0x4d7   : > { %2971 = vpow2.f32 %v1031_v30  ;;  %v2883_v30 = vld [vmem:[#allocation10 + $0x20] sm:$0xff]  }
 0x4e1   : > { %v2972_v31 = vpop.eup %2971 }
 0x4e2   : > { %v1033_v32 = vsel %vm908_vm3, %v2972_v31, 0.0 }
 0x4e3   : > { %1034 = vadd.xlane.f32.xlu0 %v1033_v32 }
 0x4f9   : > { %1040 = vrot.lane.b32.xlu0 %v3686_v58, %s3297_s17  ;;  %s3914_s17 = sld [smem:[#allocation24_spill]] }
 0x4fd   : > { %v917_v33 = vpop.xlane.xlu0 %916  ;;  %1205 = vrot.lane.b32.xlu0 %v3688_v62, %s3298_s21 }
 0x4fe   : > { %2973 = vrcp.f32 %v917_v33 }
 0x508   : > { %v2974_v34 = vpop.eup %2973 }
 0x509   : > { %v919_v35 = vmul.f32 %v2974_v34, %v2970_v26 }
 0x50b   : > { %v920_v36 = vpack.c.bf16 %v919_v35, %v919_v35 }
 0x50d   : > { %2657 = vmatmul.mubr.msk.bf16.vlgmr.msra.gmra.mrb[4].mxu1 %vm908_vm3, %v920_v36  ;;  %v2884_v36 = vld [vmem:[#allocation10 + $0x28] sm:$0xff]  }
 0x50e   : > { %2668 = vmatprep.mubr.msk.bf16.mxu1 %vm3296_vm0, %v3294_v3 }
 0x570   : > { %v1035_v39 = vpop.xlane.xlu0 %1034 }
 0x571   : > { %2975 = vrcp.f32 %v1035_v39 }
 0x574   : > { %v1041_v40 = vpop.permute.xlu0 %1040 }
 0x575   : > { %v1046_v41 = vsel %vm924_vm1, %v1041_v40, 0 }
 0x576   : > { %2667 = vmatpush3.bf16.msra.mxu1 %v1046_v41 }
 0x577   : > { %2680 = vmatprep.subr.bf16.mxu1 %v3294_v3 }
 0x578   : > { %v1206_v56 = vpop.permute.xlu0 %1205 }
 0x579   : > { %v1211_v63 = vsel %vm859_vm2, %v1206_v56, 0 }
 0x57b   : > { %v2976_v44 = vpop.eup %2975 }
 0x57c   : > { %v1037_v47 = vmul.f32 %v2976_v44, %v2972_v31 }
 0x57e   : > { %v1038_v49 = vpack.c.bf16 %v1037_v47, %v1037_v47 }
 0x580   : > { %2669 = vmatmul.mubr.msk.bf16.vlgmr.msra.gmra.mrb[8].mxu1 %vm908_vm3, %v1038_v49 }
 0x581   : > { %2681 = vmatpush3.bf16.msra.mxu1 %v2879_v48  ;;  %2684 = vmatprep.mubr.msk.bf16.mxu1 %vm3296_vm0, %v3294_v3 }
 0x582   : > { %2682 = vmatprep.subr.bf16.mxu1 %v3294_v3 }
 0x585   : > { %2683 = vmatpush3.bf16.msra.mxu1 %v2880_v50 }
 0x586   : > { %2694 = vmatprep.subr.bf16.mxu1 %v3294_v3 }
 0x5e0   : > { %v962_v51 = vpop.f32.mrb[4].mxu1 }
 0x5e1   : > { %v968_v52 = vpack.c.bf16 %v962_v51, %v962_v51  ;;  %v2658_v53 = vpop.f32.mrb[5].mxu1 }
 0x5e2   : > { %v965_v54 = vpop.f32.mrb[6].mxu1 }
 0x5e3   : > { %v2659_v55 = vpop.f32.mrb[7].mxu1  ;;  %2685 = vmatmul.mubr.msk.bf16.vlgmr.msra.gmra.mrb[12].mxu1 %vm859_vm2, %v968_v52 }
 0x5e4   : > { %2696 = vmatprep.mubr.msk.bf16.mxu1 %vm3296_vm0, %v3294_v3 }
 0x653   : > { %v1082_v57 = vpop.f32.mrb[8].mxu1 }
 0x654   : > { %v1088_v59 = vpack.c.bf16 %v1082_v57, %v1082_v57  ;;  %v2670_v60 = vpop.f32.mrb[9].mxu1 }
 0x655   : > { %v1085_v61 = vpop.f32.mrb[10].mxu1 }
 0x656   : > { %v2671_v1 = vpop.f32.mrb[11].mxu1  ;;  %2677 = vmatmul.mubr.msk.bf16.vlgmr.msra.gmra.mrb[12].mxu0 %vm859_vm2, %v1088_v59  ;;  %v2885_v61 = vld [vmem:[#allocation10 + $0x30] sm:$0xff]  }
 0x657   : > { %2689 = vmatpush3.bf16.xpose.msra.mxu0 %v1211_v63  ;;  %2690 = vmatprep.mubr.msk.bf16.mxu0 %vm3296_vm0, %v3294_v3 }
 0x658   : > { %2700 = vmatprep.subr.bf16.mxu0 %v3294_v3 }
 0x65e   : > { %2691 = vmatmul.mubr.msk.bf16.vlgmr.msra.gmra.mrb[16].mxu0 %vm859_vm2, %v1204_v4 }
 0x65f   : > { %2704 = vmatprep.mubr.msk.bf16.mxu0 %vm3296_vm0, %v3294_v3  ;;  %2701 = vmatpush3.bf16.msra.mxu0 %v2883_v30  ;;  %v2896_v30 = vld [vmem:[#allocation11 + $0x28] ss:$16 sps:$4 sm:$0xff]  }
 0x660   : > { %2702 = vmatprep.subr.bf16.mxu0 %v3294_v3 }
 0x663   : > { %2703 = vmatpush3.bf16.msra.mxu0 %v2884_v36  ;;  %v2907_v36 = vld [vmem:[#allocation11 + $0x64] ss:$16 sps:$4 sm:$0xff]  }
 0x664   : > { %2714 = vmatprep.subr.bf16.mxu0 %v3294_v3 }
 0x6b6   : > { %v1197_v5 = vpop.f32.mrb[12].mxu1 }
 0x6b7   : > { %v2686_v6 = vpop.f32.mrb[13].mxu1 }
 0x6b8   : > { %v1200_v7 = vpop.f32.mrb[14].mxu1 }
 0x6b9   : > { %v2687_v9 = vpop.f32.mrb[15].mxu1 }
 0x729   : > { %v1142_v10 = vpop.f32.mrb[12].mxu0 }
 0x72a   : > { %v3751_v11 = vadd.f32 %v1197_v5, %v1142_v10  ;;  %v2678_v12 = vpop.f32.mrb[13].mxu0  ;;  %v2886_v10 = vld [vmem:[#allocation10 + $0x38] sm:$0xff]  }
 0x72b   : > { %v1145_v13 = vpop.f32.mrb[14].mxu0 }
 0x72c   : > { %v2679_v14 = vpop.f32.mrb[15].mxu0 }
 0x731   : > { %v1247_v15 = vpop.f32.mrb[16].mxu0 }
 0x732   : > { %v1253_v16 = vmul.f32 0.17677669, %v1247_v15  ;;  %v2692_v17 = vpop.f32.mrb[17].mxu0 }
 0x733   : > { %v1250_v18 = vpop.f32.mrb[18].mxu0 }
 0x734   : > { %v2693_v19 = vpop.f32.mrb[19].mxu0  ;;  %v1254_v20 = vadd.f32 %v1253_v16, %v3714_v8 }
 0x735   : > { %v2471_v19 = vld [vmem:[%s3912_s24] ss:$0 sm:$0xff]  ;;  %s2544_s24 = sshll.u32 %s3397_s19, 7  ;;  %s3300_s19 = smov [#allocation14]  }
 0x736   : > { %v1255_v21 = vsel %vm908_vm3, %v1254_v20, -inf  ;;  %s3205_s8 = sshll.u32 %s3300_s19, 4  ;;  %s3206_s8 = int_to_ptr.vmem [resolvable:$false] %s3205_s8 }
 0x737   : > { %1256 = vmax.xlane.f32.xlu0 %v1255_v21  ;;  %p3208_p1 = scmp.lt.s32.totalorder %s3825_s11, %s3206_s8 }
 0x74d   : > { %1267 = vrot.lane.b32.xlu0 %v3686_v58, %s3298_s21  ;;  %s3915_s21 = sld [smem:[#allocation25_spill]] }
 0x751   : > { %1376 = vrot.lane.b32.xlu0 %v3697_v2, %s3299_s13 }
 0x7c4   : > { %v1257_v22 = vpop.xlane.xlu0 %1256 }
 0x7c5   : > { %v1258_v23 = vsub.f32 %v1254_v20, %v1257_v22 }
 0x7c7   : > { %v1259_v24 = vmul.f32 1.442695, %v1258_v23  ;;  %v2887_v23 = vld [vmem:[#allocation11] ss:$16 sps:$4 sm:$0xff]  }
 0x7c8   : > { %v1268_v26 = vpop.permute.xlu0 %1267 }
 0x7c9   : > { %2977 = vpow2.f32 %v1259_v24  ;;  %v1273_v27 = vsel %vm924_vm1, %v1268_v26, 0  ;;  %v2889_v24 = vld [vmem:[#allocation11 + $0x4] ss:$16 sps:$4 sm:$0xff]   ;;  %v2890_v26 = vld [vmem:[#allocation11 + $0x8] ss:$16 sps:$4 sm:$0xff]  }
 0x7ca   : > { %2695 = vmatpush3.bf16.msra.mxu1 %v1273_v27  ;;  %v2892_v27 = vld [vmem:[#allocation11 + $0xc] ss:$16 sps:$4 sm:$0xff]  }
 0x7cb   : > { %2708 = vmatprep.subr.bf16.mxu1 %v3294_v3 }
 0x7d3   : > { %v2978_v28 = vpop.eup %2977 }
 0x7d4   : > { %v1261_v29 = vsel %vm908_vm3, %v2978_v28, 0.0 }
 0x7d5   : > { %1262 = vadd.xlane.f32.xlu1 %v1261_v29  ;;  %v2893_v29 = vld [vmem:[#allocation11 + $0x20] ss:$16 sps:$4 sm:$0xff]  }
 0x7e6   : > { %1378 = vrot.lane.b32.xlu1 %v3688_v62, %s3299_s13  ;;  %v1377_v62 = vpop.permute.xlu0 %1376 }
 0x862   : > { %v1263_v2 = vpop.xlane.xlu1 %1262 }
 0x863   : > { %2979 = vrcp.f32 %v1263_v2  ;;  %v2901_v2 = vld [vmem:[#allocation11 + $0x44] ss:$16 sps:$4 sm:$0xff]  }
 0x866   : > { %v1379_v33 = vpop.permute.xlu1 %1378 }
 0x867   : > { %v1384_v35 = vsel %vm859_vm2, %v1379_v33, 0 }
 0x86d   : > { %v2980_v31 = vpop.eup %2979 }
 0x86e   : > { %v1265_v32 = vmul.f32 %v2980_v31, %v2978_v28  ;;  %v2898_v28 = vld [vmem:[#allocation11 + $0x2c] ss:$16 sps:$4 sm:$0xff]   ;;  %v2899_v31 = vld [vmem:[#allocation11 + $0x40] ss:$16 sps:$4 sm:$0xff]  }
 0x870   : > { %v1266_v34 = vpack.c.bf16 %v1265_v32, %v1265_v32  ;;  %v2902_v32 = vld [vmem:[#allocation11 + $0x48] ss:$16 sps:$4 sm:$0xff]  }
 0x872   : > { %2697 = vmatmul.mubr.msk.bf16.vlgmr.msra.gmra.mrb[16].mxu1 %vm908_vm3, %v1266_v34 }
 0x873   : > { %2709 = vmatpush3.bf16.xpose.msra.mxu1 %v1384_v35  ;;  %2710 = vmatprep.mubr.msk.bf16.mxu1 %vm3296_vm0, %v3294_v3 }
 0x874   : > { %2720 = vmatprep.subr.bf16.mxu1 %v3294_v3 }
 0x87a   : > { %2711 = vmatmul.mubr.msk.bf16.vlgmr.msra.gmra.mrb[20].mxu1 %vm859_vm2, %v1377_v62 }
 0x87b   : > { %2724 = vmatprep.mubr.msk.bf16.mxu1 %vm3296_vm0, %v3294_v3  ;;  %2721 = vmatpush3.bf16.msra.mxu1 %v2885_v61 }
 0x87c   : > { %2722 = vmatprep.subr.bf16.mxu1 %v3294_v3 }
 0x87f   : > { %2723 = vmatpush3.bf16.msra.mxu1 %v2886_v10  ;;  %v2935_v10 = vld [vmem:[#allocation13 + $0x40] sm:$0xff]  }
 0x880   : > { %1841 = vmatprep.subr.bf16.mxu1 %v2892_v27  ;;  %v2951_v27 = vld [vmem:[#allocation13 + $0x60] sm:$0xff]  }
 0x945   : > { %v1309_v37 = vpop.f32.mrb[16].mxu1 }
 0x946   : > { %v1315_v38 = vpack.c.bf16 %v1309_v37, %v1309_v37  ;;  %v2698_v39 = vpop.f32.mrb[17].mxu1  ;;  %v2910_v37 = vld [vmem:[#allocation11 + $0x6c] ss:$16 sps:$4 sm:$0xff]  }
 0x947   : > { %v1312_v40 = vpop.f32.mrb[18].mxu1  ;;  %v2908_v39 = vld [vmem:[#allocation11 + $0x68] ss:$16 sps:$4 sm:$0xff]  }
 0x948   : > { %v2699_v41 = vpop.f32.mrb[19].mxu1  ;;  %2705 = vmatmul.mubr.msk.bf16.vlgmr.msra.gmra.mrb[20].mxu0 %vm859_vm2, %v1315_v38  ;;  %v2905_v38 = vld [vmem:[#allocation11 + $0x60] ss:$16 sps:$4 sm:$0xff]   ;;  %v2913_v40 = vld [vmem:[#allocation11 + $0x84] ss:$16 sps:$4 sm:$0xff]  }
 0x949   : > { %2716 = vmatprep.mubr.msk.bf16.mxu0 %vm3296_vm0, %v3294_v3  ;;  %v2916_v41 = vld [vmem:[#allocation11 + $0x8c] ss:$16 sps:$4 sm:$0xff]  }
 0x94d   : > { %v1420_v44 = vpop.f32.mrb[20].mxu1 }
 0x94e   : > { %v1426_v47 = vmul.f32 0.17677669, %v1420_v44  ;;  %v2712_v48 = vpop.f32.mrb[21].mxu1  ;;  %v2911_v44 = vld [vmem:[#allocation11 + $0x80] ss:$16 sps:$4 sm:$0xff]  }
 0x94f   : > { %v1423_v49 = vpop.f32.mrb[22].mxu1  ;;  %v2919_v48 = vld [vmem:[#allocation11 + $0xa4] ss:$16 sps:$4 sm:$0xff]  }
 0x950   : > { %v2713_v50 = vpop.f32.mrb[23].mxu1  ;;  %v1427_v51 = vadd.f32 %v1426_v47, %v3714_v8  ;;  %v2914_v47 = vld [vmem:[#allocation11 + $0x88] ss:$16 sps:$4 sm:$0xff]   ;;  %v2922_v49 = vld [vmem:[#allocation11 + $0xac] ss:$16 sps:$4 sm:$0xff]  }
 0x951   : > { %v2917_v50 = vld [vmem:[#allocation11 + $0xa0] ss:$16 sps:$4 sm:$0xff]  }
 0x952   : > { %v1428_v52 = vsel %vm908_vm3, %v1427_v51, -inf }
 0x953   : > { %1429 = vmax.xlane.f32.xlu0 %v1428_v52  ;;  %v2925_v52 = vld [vmem:[#allocation11 + $0xc4] ss:$16 sps:$4 sm:$0xff]  }
 0x969   : > { %1440 = vrot.lane.b32.xlu0 %v3686_v58, %s3299_s13 }
 0x9e0   : > { %v1430_v53 = vpop.xlane.xlu0 %1429 }
 0x9e1   : > { %v1431_v54 = vsub.f32 %v1427_v51, %v1430_v53  ;;  %v2920_v51 = vld [vmem:[#allocation11 + $0xa8] ss:$16 sps:$4 sm:$0xff]   ;;  %v2928_v53 = vld [vmem:[#allocation11 + $0xcc] ss:$16 sps:$4 sm:$0xff]  }
 0x9e3   : > { %v1432_v55 = vmul.f32 1.442695, %v1431_v54  ;;  %v2923_v54 = vld [vmem:[#allocation11 + $0xc0] ss:$16 sps:$4 sm:$0xff]  }
 0x9e4   : > { %v1441_v56 = vpop.permute.xlu0 %1440 }
 0x9e5   : > { %2981 = vpow2.f32 %v1432_v55  ;;  %v1446_v57 = vsel %vm924_vm1, %v1441_v56, 0  ;;  %v2926_v55 = vld [vmem:[#allocation11 + $0xc8] ss:$16 sps:$4 sm:$0xff]   ;;  %v2931_v56 = vld [vmem:[#allocation11 + $0xe4] ss:$16 sps:$4 sm:$0xff]  }
 0x9e6   : > { %2715 = vmatpush3.bf16.msra.mxu0 %v1446_v57  ;;  %v2934_v57 = vld [vmem:[#allocation11 + $0xec] ss:$16 sps:$4 sm:$0xff]  }
 0x9e7   : > { %1800 = vmatprep.subr.bf16.mxu0 %v2889_v24  ;;  %v2949_v24 = vld [vmem:[#allocation13 + $0x18] sm:$0xff]  }
 0x9ef   : > { %v2982_v59 = vpop.eup %2981 }
 0x9f0   : > { %v1434_v60 = vsel %vm908_vm3, %v2982_v59, 0.0 }
 0x9f1   : > { %1435 = vadd.xlane.f32.xlu1 %v1434_v60  ;;  %v2932_v60 = vld [vmem:[#allocation11 + $0xe8] ss:$16 sps:$4 sm:$0xff]  }
 0xa1b   : > { %v1369_v8 = vpop.f32.mrb[20].mxu0 }
 0xa1c   : > { %v1375_v63 = vadd.f32 %v1369_v8, %v3751_v11  ;;  %v2706_v58 = vpop.f32.mrb[21].mxu0 }
 0xa1d   : > { %v1372_v1 = vpop.f32.mrb[22].mxu0  ;;  %v2472_v58 = vld [vmem:[%s3913_s1] ss:$0 sm:$0xff] }
 0xa1e   : > { %v2707_v4 = vpop.f32.mrb[23].mxu0 }
 0xa7e   : > { %v1436_v5 = vpop.xlane.xlu1 %1435 }
 0xa7f   : > { %2983 = vrcp.f32 %v1436_v5  ;;  %v2473_v5 = vld [vmem:[%s3914_s17] ss:$0 sm:$0xff]  ;;  %s3823_s17 = scalar_lea.hbm %s3917_s28, %s2544_s24 }
 0xa89   : > { %v2984_v6 = vpop.eup %2983 }
 0xa8a   : > { %v1438_v7 = vmul.f32 %v2984_v6, %v2982_v59  ;;  %v2929_v59 = vld [vmem:[#allocation11 + $0xe0] ss:$16 sps:$4 sm:$0xff]  }
 0xa8c   : > { %v1439_v9 = vpack.c.bf16 %v1438_v7, %v1438_v7 }
 0xa8e   : > { %2717 = vmatmul.mubr.msk.bf16.vlgmr.msra.gmra.mrb[24].mxu0 %vm908_vm3, %v1439_v9 }
 0xa8f   : > { %1832 = vmatprep.mubr.bf16.mxu0 %v3295_v25  ;;  %1801 = vmatpush1.bf16.msra.mxu0 %v2887_v23  ;;  %v2948_v23 = vld [vmem:[#allocation13 + $0xd8] sm:$0xff]  }
 0xb61   : > { %v1482_v12 = vpop.f32.mrb[24].mxu0 }
 0xb62   : > { %v1488_v13 = vpack.c.bf16 %v1482_v12, %v1482_v12  ;;  %v2718_v3 = vpop.f32.mrb[25].mxu0  ;;  %v2936_v12 = vld [vmem:[#allocation13 + $0xc0] sm:$0xff]  }
 0xb63   : > { %v1485_v14 = vpop.f32.mrb[26].mxu0  ;;  %v2938_v3 = vld [vmem:[#allocation13 + $0x80] sm:$0xff]  }
 0xb64   : > { %v2719_v15 = vpop.f32.mrb[27].mxu0  ;;  %2725 = vmatmul.mubr.msk.bf16.vlgmr.msra.gmra.mrb[24].mxu1 %vm859_vm2, %v1488_v13  ;;  %v2937_v13 = vld [vmem:[#allocation13] sm:$0xff]   ;;  %v2939_v14 = vld [vmem:[#allocation13 + $0x48] sm:$0xff]  }
 0xb65   : > { %1873 = vmatprep.mubr.bf16.mxu1 %v3295_v25  ;;  %v2895_v25 = vld [vmem:[#allocation11 + $0x24] ss:$16 sps:$4 sm:$0xff]   ;;  %1842 = vmatpush1.bf16.msra.mxu1 %v2890_v26  ;;  %v2940_v15 = vld [vmem:[#allocation13 + $0xc8] sm:$0xff]   ;;  %v2950_v26 = vld [vmem:[#allocation13 + $0x98] sm:$0xff]  }
 0xb66   : > { %1802 = vmatprep.subr.bf16.mxu0 %v2895_v25  ;;  %1843 = vmatprep.subr.bf16.mxu1 %v2898_v28  ;;  %v2952_v25 = vld [vmem:[#allocation13 + $0xe0] sm:$0xff]  }
 0xb67   : > { %1803 = vmatpush1.bf16.msra.mxu0 %v2893_v29  ;;  %v2953_v28 = vld [vmem:[#allocation13 + $0x20] sm:$0xff]  }
 0xb68   : > { %1804 = vmatprep.subr.bf16.mxu0 %v2901_v2  ;;  %v2954_v29 = vld [vmem:[#allocation13 + $0xa0] sm:$0xff]   ;;  %v2956_v2 = vld [vmem:[#allocation13 + $0xe8] sm:$0xff]  }
 0xb69   : > { %1844 = vmatpush1.bf16.msra.mxu1 %v2896_v30  ;;  %v2955_v30 = vld [vmem:[#allocation13 + $0x68] sm:$0xff]  }
 0xb6b   : > { %1805 = vmatpush1.bf16.msra.mxu0 %v2899_v31  ;;  %v2958_v31 = vld [vmem:[#allocation13 + $0xa8] sm:$0xff]  }
 0xb6c   : > { %1806 = vmatprep.subr.bf16.mxu0 %v2907_v36  ;;  %v2964_v36 = vld [vmem:[#allocation13 + $0xf8] sm:$0xff]  }
 0xb6f   : > { %1807 = vmatpush1.bf16.msra.mxu0 %v2905_v38  ;;  %v2966_v38 = vld [vmem:[#allocation13 + $0xb8] sm:$0xff]  }
 0xb70   : > { %1808 = vmatprep.subr.bf16.mxu0 %v2913_v40  ;;  %v1634_v40 = vsub.s32 3, %v3672_v42 }
 0xb73   : > { %1809 = vmatpush1.bf16.msra.mxu0 %v2911_v44 }
 0xb74   : > { %1810 = vmatprep.subr.bf16.mxu0 %v2919_v48 }
 0xb77   : > { %1811 = vmatpush1.bf16.msra.mxu0 %v2917_v50 }
 0xb78   : > { %1812 = vmatprep.subr.bf16.mxu0 %v2925_v52 }
 0xb7b   : > { %1813 = vmatpush1.bf16.msra.mxu0 %v2923_v54 }
 0xb7c   : > { %1814 = vmatprep.subr.bf16.mxu0 %v2931_v56 }
 0xb7f   : > { %1815 = vmatpush1.bf16.msra.mxu0 %v2929_v59 }
 0xb80   : > { %2584 = vmatprep.subr.bf16.mxu0 %v2935_v10 }
 0xc37   : > { %v1542_v11 = vpop.f32.mrb[24].mxu1 }
 0xc38   : > { %v1548_v16 = vadd.f32 %v1542_v11, %v1375_v63  ;;  %v2726_v17 = vpop.f32.mrb[25].mxu1  ;;  %v2941_v11 = vld [vmem:[#allocation13 + $0x8] sm:$0xff]  }
 0xc39   : > { %v1545_v18 = vpop.f32.mrb[26].mxu1  ;;  %v2943_v17 = vld [vmem:[#allocation13 + $0x50] sm:$0xff]  }
 0xc3a   : > { %v1549_v20 = vadd.f32 %v1548_v16, %v3651_v0  ;;  %v2727_v21 = vpop.f32.mrb[27].mxu1  ;;  %v2904_v0 = vld [vmem:[#allocation11 + $0x4c] ss:$16 sps:$4 sm:$0xff]   ;;  %v2944_v18 = vld [vmem:[#allocation13 + $0xd0] sm:$0xff]  }
 0xc3b   : > { %1845 = vmatprep.subr.bf16.mxu1 %v2904_v0  ;;  %v2942_v16 = vld [vmem:[#allocation13 + $0x88] sm:$0xff]   ;;  %v2947_v21 = vld [vmem:[#allocation13 + $0x58] sm:$0xff]  }
 0xc3c   : > { %v3793_v22 = vadd.f32 %v2471_v19, %v1549_v20  ;;  %1846 = vmatpush1.bf16.msra.mxu1 %v2902_v32  ;;  %v2945_v19 = vld [vmem:[#allocation13 + $0x10] sm:$0xff]   ;;  %v2957_v0 = vld [vmem:[#allocation13 + $0x28] sm:$0xff]  }
 0xc3d   : > { %1847 = vmatprep.subr.bf16.mxu1 %v2910_v37  ;;  %v2946_v20 = vld [vmem:[#allocation13 + $0x90] sm:$0xff]   ;;  %v2965_v37 = vld [vmem:[#allocation13 + $0x38] sm:$0xff]  }
 0xc3e   : > { %1560 = vadd.xlane.f32.xlu1 %v3793_v22  ;;  %v2959_v32 = vld [vmem:[#allocation13 + $0x70] sm:$0xff]  }
 0xc40   : > { %1848 = vmatpush1.bf16.msra.mxu1 %v2908_v39  ;;  %v1618_v39 = vld [vmem:[%s3915_s21] sm:$0xf]  ;;  %s3207_s21 = scalar_lea.vmem %s3206_s8, 256 }
 0xc41   : > { %1849 = vmatprep.subr.bf16.mxu1 %v2916_v41  ;;  %v1623_v41 = vrot.slane %v1618_v39, %v633_v46  ;;  %v1631_v44 = vrot.slane %v1618_v39, %v641_v43  ;;  %v1635_v48 = vrot.slane %v1618_v39, %v1634_v40  ;;  %p3209_p3 = scmp.lt.s32.totalorder %s3207_s21, %s3201_s26 }
 0xc43   : > { %p3210_p2 = por %p3209_p3, %p3208_p1 }
 0xc44   : > { %1850 = vmatpush1.bf16.msra.mxu1 %v2914_v47  ;;  %v1627_v47 = vrot.slane %v1618_v39, %v637_v45 }
 0xc45   : > { %1851 = vmatprep.subr.bf16.mxu1 %v2922_v49  ;;  %p3211_p0 = pnand %p3210_p2, %p3204_p13 }
 0xc48   : > { %1852 = vmatpush1.bf16.msra.mxu1 %v2920_v51 }
 0xc49   : > { %1853 = vmatprep.subr.bf16.mxu1 %v2928_v53 }
 0xc4c   : > { %1854 = vmatpush1.bf16.msra.mxu1 %v2926_v55 }
 0xc4d   : > { %1855 = vmatprep.subr.bf16.mxu1 %v2934_v57 }
 0xc50   : > { %1856 = vmatpush1.bf16.msra.mxu1 %v2932_v60 }
 0xc51   : > { %2606 = vmatprep.subr.bf16.mxu1 %v2936_v12 }
 0xccb   : > { %v1561_v33 = vpop.xlane.xlu1 %1560 }
 0xccc   : > { %v1562_v34 = vmul.f32 0.0078125, %v1561_v33  ;;  %v2960_v33 = vld [vmem:[#allocation13 + $0xf0] sm:$0xff]  }
 0xcce   : > { %v1563_v35 = vsub.f32 %v3793_v22, %v1562_v34  ;;  %v2961_v34 = vld [vmem:[#allocation13 + $0x30] sm:$0xff]  }
 0xcd0   : > { %v1564_v62 = vmul.f32 %v1563_v35, %v1563_v35 }
 0xcd2   : > { %1565 = vadd.xlane.f32.xlu1 %v1564_v62  ;;  %v2963_v62 = vld [vmem:[#allocation13 + $0x78] sm:$0xff]  }
 0xd5f   : > { %v1566_v61 = vpop.xlane.xlu1 %1565 }
 0xd60   : > { %v1567_v8 = vmul.f32 0.0078125, %v1566_v61 }
 0xd62   : > { %v1568_v63 = vadd.f32 1e-05, %v1567_v8 }
 0xd64   : > { %2985 = vrsqrt.f32 %v1568_v63 }
 0xd6e   : > { %v2986_v1 = vpop.eup %2985 }
 0xd6f   : > { %v1576_v4 = vmul.f32 %v2986_v1, %v2472_v58 }
 0xd71   : > { %v1577_v6 = vmul.f32 %v1576_v4, %v1563_v35  ;;  %v2962_v35 = vld [vmem:[#allocation13 + $0xb0] sm:$0xff]  }
 0xd73   : > { %v1584_v7 = vadd.f32 %v2473_v5, %v1577_v6 }
 0xd75   : > { %v1585_v9 = vpack.c.bf16 %v1584_v7, %v1584_v7 }
 0xd77   : > { %1833 = vmatmul.mubr.bf16.vlgmr.msra.gmra.mrb[28].mxu0 %v1585_v9  ;;  %1874 = vmatmul.mubr.bf16.vlgmr.msra.gmra.mrb[28].mxu1 %v1585_v9 }
 0xd78   : > { %2585 = vmatpush3.bf16.msra.mxu0 %v2937_v13  ;;  %2607 = vmatpush3.bf16.msra.mxu1 %v2938_v3 }
 0xd79   : > { %2586 = vmatprep.subr.bf16.mxu0 %v2939_v14  ;;  %2608 = vmatprep.subr.bf16.mxu1 %v2940_v15 }
 0xd7c   : > { %2587 = vmatpush3.bf16.msra.mxu0 %v2941_v11  ;;  %2609 = vmatpush3.bf16.msra.mxu1 %v2942_v16 }
 0xd7d   : > { %2588 = vmatprep.subr.bf16.mxu0 %v2943_v17  ;;  %2610 = vmatprep.subr.bf16.mxu1 %v2944_v18 }
 0xd80   : > { %2589 = vmatpush3.bf16.msra.mxu0 %v2945_v19  ;;  %2611 = vmatpush3.bf16.msra.mxu1 %v2946_v20 }
 0xd81   : > { %2590 = vmatprep.subr.bf16.mxu0 %v2947_v21  ;;  %2612 = vmatprep.subr.bf16.mxu1 %v2948_v23 }
 0xd84   : > { %2591 = vmatpush3.bf16.msra.mxu0 %v2949_v24  ;;  %2613 = vmatpush3.bf16.msra.mxu1 %v2950_v26 }
 0xd85   : > { %2592 = vmatprep.subr.bf16.mxu0 %v2951_v27  ;;  %2614 = vmatprep.subr.bf16.mxu1 %v2952_v25 }
 0xd88   : > { %2593 = vmatpush3.bf16.msra.mxu0 %v2953_v28  ;;  %2615 = vmatpush3.bf16.msra.mxu1 %v2954_v29 }
 0xd89   : > { %2594 = vmatprep.subr.bf16.mxu0 %v2955_v30  ;;  %2616 = vmatprep.subr.bf16.mxu1 %v2956_v2 }
 0xd8c   : > { %2595 = vmatpush3.bf16.msra.mxu0 %v2957_v0  ;;  %2617 = vmatpush3.bf16.msra.mxu1 %v2958_v31 }
 0xd8d   : > { %2596 = vmatprep.subr.bf16.mxu0 %v2959_v32  ;;  %2618 = vmatprep.subr.bf16.mxu1 %v2960_v33 }
 0xd90   : > { %2597 = vmatpush3.bf16.msra.mxu0 %v2961_v34  ;;  %2619 = vmatpush3.bf16.msra.mxu1 %v2962_v35  ;;  %v2542_v34 = vld [vmem:[%s3916_s27] ss:$0 sm:$0xff] }
 0xd91   : > { %2598 = vmatprep.subr.bf16.mxu0 %v2963_v62  ;;  %2620 = vmatprep.subr.bf16.mxu1 %v2964_v36 }
 0xd94   : > { %2599 = vmatpush3.bf16.msra.mxu0 %v2965_v37  ;;  %2621 = vmatpush3.bf16.msra.mxu1 %v2966_v38 }
 0xe4a   : > { %v1834_v49 = vpop.f32.mrb[28].mxu0  ;;  %v1875_v50 = vpop.f32.mrb[28].mxu1 }
 0xe4b   : > { %v1835_v51 = vadd.f32 %v1834_v49, %v1623_v41  ;;  %v1876_v52 = vadd.f32 %v1875_v50, %v1631_v44  ;;  %v1836_v53 = vpop.f32.mrb[29].mxu0  ;;  %v1877_v54 = vpop.f32.mrb[29].mxu1 }
 0xe4c   : > { %v1837_v55 = vadd.f32 %v1836_v53, %v1627_v47  ;;  %v1878_v56 = vadd.f32 %v1877_v54, %v1635_v48  ;;  %v1838_v57 = vpop.f32.mrb[30].mxu0  ;;  %v1879_v59 = vpop.f32.mrb[30].mxu1 }
 0xe4d   : > { %v2506_v60 = vmul.f32 -1.702, %v1835_v51  ;;  %v2508_v61 = vmul.f32 -1.702, %v1876_v52  ;;  %v1839_v46 = vpop.f32.mrb[31].mxu0  ;;  %v1880_v8 = vpop.f32.mrb[31].mxu1 }
 0xe4e   : > { %v2507_v63 = vmul.f32 -1.702, %v1837_v55  ;;  %v2509_v43 = vmul.f32 -1.702, %v1878_v56 }
 0xe4f   : > { %v1890_v58 = vmul.f32 1.442695, %v2506_v60  ;;  %v1894_v42 = vmul.f32 1.442695, %v2508_v61 }
 0xe50   : > { %v1892_v45 = vmul.f32 1.442695, %v2507_v63  ;;  %v1896_v1 = vmul.f32 1.442695, %v2509_v43 }
 0xe51   : > { %2987 = vpow2.f32 %v1890_v58 }
 0xe52   : > { %2989 = vpow2.f32 %v1894_v42 }
 0xe53   : > { %2991 = vpow2.f32 %v1892_v45 }
 0xe54   : > { %2993 = vpow2.f32 %v1896_v1 }
 0xe5b   : > { %v2988_v4 = vpop.eup %2987 }
 0xe5c   : > { %v2990_v5 = vpop.eup %2989  ;;  %v1898_v6 = vadd.f32 1.0, %v2988_v4 }
 0xe5d   : > { %v2992_v7 = vpop.eup %2991  ;;  %v1900_v9 = vadd.f32 1.0, %v2990_v5 }
 0xe5e   : > { %v2994_v10 = vpop.eup %2993  ;;  %2995 = vrcp.f32 %v1898_v6  ;;  %v1899_v12 = vadd.f32 1.0, %v2992_v7 }
 0xe5f   : > { %2997 = vrcp.f32 %v1900_v9  ;;  %v1901_v13 = vadd.f32 1.0, %v2994_v10 }
 0xe60   : > { %2999 = vrcp.f32 %v1899_v12 }
 0xe61   : > { %3001 = vrcp.f32 %v1901_v13 }
 0xe68   : > { %v2996_v3 = vpop.eup %2995 }
 0xe69   : > { %v2998_v14 = vpop.eup %2997  ;;  %v1910_v11 = vmul.f32 %v2996_v3, %v1835_v51 }
 0xe6a   : > { %v3000_v15 = vpop.eup %2999  ;;  %v1912_v17 = vmul.f32 %v2998_v14, %v1876_v52 }
 0xe6b   : > { %v3002_v16 = vpop.eup %3001  ;;  %v1911_v18 = vmul.f32 %v3000_v15, %v1837_v55  ;;  %v1914_v21 = vpack.c.bf16 %v1910_v11, %v1910_v11 }
 0xe6c   : > { %v1913_v19 = vmul.f32 %v3002_v16, %v1878_v56  ;;  %v1916_v24 = vpack.c.bf16 %v1912_v17, %v1912_v17 }
 0xe6d   : > { %v1915_v20 = vpack.c.bf16 %v1911_v18, %v1911_v18 }
 0xe6e   : > { %v1917_v23 = vpack.c.bf16 %v1913_v19, %v1913_v19 }
 0xe6f   : > { %2206 = vmatprep.mubr.bf16.mxu0 %v1915_v20 }
 0xe70   : > { %2246 = vmatprep.mubr.bf16.mxu1 %v1917_v23  ;;  %2207 = vmatmul.mubr.bf16.vlgmr.msra.gmra.mrb[32].mxu0 %v1914_v21 }
 0xe71   : > { %2247 = vmatmul.mubr.bf16.vlgmr.msra.gmra.mrb[32].mxu1 %v1916_v24 }
 0xf43   : > { %v2600_v26 = vpop.f32.mrb[32].mxu0 }
 0xf44   : > { %v2622_v27 = vpop.f32.mrb[32].mxu1  ;;  %v2601_v25 = vpop.f32.mrb[33].mxu0 }
 0xf45   : > { %v2602_v28 = vadd.f32 %v2601_v25, %v2600_v26  ;;  %v2623_v29 = vpop.f32.mrb[33].mxu1  ;;  %v2603_v30 = vpop.f32.mrb[34].mxu0 }
 0xf46   : > { %v2624_v2 = vadd.f32 %v2623_v29, %v2622_v27  ;;  %v2625_v0 = vpop.f32.mrb[34].mxu1  ;;  %v2604_v31 = vpop.f32.mrb[35].mxu0 }
 0xf47   : > { %v2626_v32 = vpop.f32.mrb[35].mxu1 }
 0xf48   : > { %v2249_v33 = vadd.f32 %v2624_v2, %v2602_v28 }
 0xf4a   : > { %v2254_v35 = vadd.f32 %v2249_v33, %v3793_v22 }
 0xf4c   : > { %v2262_v62 = vadd.f32 %v2542_v34, %v2254_v35 }
 0xf4e   : > { %2263 = vst [vmem:[%s565_s25] sm:$0xff] %v2262_v62 }
 0xf4f   : > { %3214 = shalt.err (!%p3211_p0)
}
 0xf50   : > { %s3215_s22 = scalar_lea.hbm %s3823_s17, 128  ;;  %s3219_s27 = scalar_lea.hbm %s3917_s28, 256 }
 0xf51   : > { %p3216_p10 = scmp.ne.s32.totalorder %s3823_s17, %s3215_s22  ;;  %p3220_p8 = scmp.lt.u32.totalorder %s3823_s17, %s3917_s28 }
 0xf52   : > { %p3221_p5 = scmp.lt.u32.totalorder %s3219_s27, %s3215_s22  ;;  %p3223_p6 = scmp.lt.u32.totalorder %s3215_s22, %s3823_s17 }
 0xf53   : > { %p3217_p11 = pnand %p3216_p10, %p3918_p9 }
 0xf54   : > { %p3222_p7 = por %p3221_p5, %p3220_p8 }
 0xf55   : > { %p3218_p12 = pneg %p3217_p11 }
 0xf56   : > { %p3224_p4 = por %p3223_p6, %p3222_p7 }
 0xf58   : > { %p3225_p13 = pnand %p3224_p4, %p3218_p12 }
 0xf5a   : > { %3228 = shalt.err (!%p3225_p13)
}
 0xf5b   : > { %2754 = dma.vmem_to_hbm [thread:$0]  (%p3918_p9), %s3825_s11, 128, %s3823_s17, %s2265_s14  }
 0xf5c PF: > { %s2290_s1 = sand.u32 1, %s3267_s29   ;;  %p3919_p1 = scmp.ne.s32.totalorder %s3903_s6, 0 }
 0xf5d   : > { %p3920_p3 = scmp.ge.s32.totalorder %s3279_s16, 2  ;;  %s2291_s20 = scalar_lea.sflag [#allocation4], %s2290_s1 }
 0xf5f   : > { %p2780_p2 = pnand %p3920_p3, %p3919_p1 }
 0xf61   : > { %3262 = dma.done.wait (!%p2780_p2), %s2291_s20, 128  }
 0xf62   : > { %3264 = vsyncadd (!%p2780_p2), %s2291_s20, 4294967168  ;;  %p30_p0 = scmp.ge.s32.totalorder %s3553_s23, 4   ;;  %s3921_s29 = smov %s3271_s30 }
 0xf63   : > { %s3922_s30 = smov %s3275_s15  ;;  %s3923_s15 = smov %s3564_s9 }
 0xf64   : > { %s3924_s16 = smov %s3553_s23  ;;  %32 = sbr.rel (!%p30_p0) target bundleno = 17 (0x11), region = 145 }
 0xf6b   :  { %2296 = vsyncpa [#allocation3], 1 }
 0xf6c   :  { %2298 = vsyncpa [#allocation3 + $0x1], 1 }
 0xf6d   :  { %2299 = vsyncpa [#allocation6], 1 }
 0xf6e   :  { %2300 = vsyncpa [#allocation9], 1 }
 0xf6f   :  { %2301 = vsyncpa [#allocation12], 1 }
 0xf70   :  { %2302 = vsyncpa [#allocation4], 1 }
 0xf71   :  { %2304 = vsyncpa [#allocation4 + $0x1], 1 }

</bundles_post_ra>
